<compile_context>
chip_gen: v7x
topology: tpu7x:2x2x1
jax: 0.10.0
libtpu: 0.0.40
codegen_flags: <defaults>
</compile_context>

<pallas_src>
import jax
import jax.numpy as jnp
from jax import lax
from jax.experimental import pallas as pl
from jax.experimental.pallas import tpu as pltpu

LANE = 128
_NEG_INF = -1e30                # finite "-inf" for softmax padding (no inf-inf NaN)
_VMEM_TILE_BUDGET = 24 << 20    # working-set budget when picking the HW tile
_VMEM_LIMIT = 48 << 20          # scoped VMEM limit (< 64 MiB physical on v7x)


# ----------------------------------------------------------------------------
# small helpers
# ----------------------------------------------------------------------------

def _round_up(n, m):
    return ((n + m - 1) // m) * m


def _pad_to(x, shape):
    """Zero-pad x up to `shape` (no-op if already that shape)."""
    pads = [(0, s - d) for d, s in zip(x.shape, shape)]
    if all(p == (0, 0) for p in pads):
        return x
    return jnp.pad(x, pads)


def _full_spec(arr):
    """BlockSpec covering a whole (weight-like) array, same block every grid step."""
    nd = arr.ndim
    return pl.BlockSpec(arr.shape, lambda b, h, _nd=nd: (0,) * _nd)


def _pick_hw_tile(hw, per_token_bytes, fixed_bytes):
    """Largest tile in {2048..128} that keeps >=2 tiles (pipeline depth) and fits
    the VMEM budget.  HW is zero-padded up to a tile multiple (exact: padded
    tokens are computed then discarded)."""
    for t in (2048, 1024, 512, 256, 128):
        hw_p = _round_up(hw, t)
        if hw_p // t >= 2 and fixed_bytes + t * per_token_bytes <= _VMEM_TILE_BUDGET:
            return t, hw_p
    return 128, _round_up(hw, 128)


# ----------------------------------------------------------------------------
# Pallas kernels
# ----------------------------------------------------------------------------

def _dm_kernel_ctx(xc_ref, bias_ref, biasq_ref, k_ref, v_ref, mask_ref,
                   win_ref, winq_ref, wo_ref, wout_ref, bout_ref, o_ref):
    """One (batch, HW-tile) per step: in-conv(+emb bias) + cross-attn + out-conv."""
    xc = xc_ref[0]                  # (T, Cin)     bf16 (real Cin; short-K matmul)
    bias = bias_ref[0]              # (1, MC_p)    f32  (b_in + time/adm embedding)
    bias_q = biasq_ref[0]           # (1, MC_p)    f32  (bias @ W_q_scaled)
    k = k_ref[0]                    # (S_p, MC_p)  bf16 (precomputed in glue)
    v = v_ref[0]                    # (S_p, MC_p)  bf16 (precomputed in glue)
    mask = mask_ref[...]            # (1, S_p)     f32  (0 real / -1e30 pad)

    # input 1x1 conv and q-projection: both depend only on xc (W_inq = W_in@W_q),
    # so the two MXU issues are back-to-back with no serial h->q dependency.
    h = jnp.dot(xc, win_ref[...], preferred_element_type=jnp.float32) + bias
    q = jnp.dot(xc, winq_ref[...], preferred_element_type=jnp.float32) + bias_q

    # cross-attention (1/sqrt(MC) already folded into W_inq / bias_q)
    logits = lax.dot_general(q.astype(jnp.bfloat16), k,
                             dimension_numbers=(((1,), (1,)), ((), ())),
                             preferred_element_type=jnp.float32) + mask
    m = jnp.max(logits, axis=-1, keepdims=True)
    p = jnp.exp(logits - m)
    p = p * pl.reciprocal(jnp.sum(p, axis=-1, keepdims=True), approx=True)
    a = jnp.dot(p.astype(jnp.bfloat16), v, preferred_element_type=jnp.float32)
    h = h + jnp.dot(a.astype(jnp.bfloat16), wo_ref[...],
                    preferred_element_type=jnp.float32)

    # SiLU (f32 elementwise; v5e has no bf16 VPU/EUP) + output 1x1 conv.
    h = h * jax.nn.sigmoid(h)
    out = jnp.dot(h.astype(jnp.bfloat16), wout_ref[...],
                  preferred_element_type=jnp.float32) + bout_ref[...]
    cs = o_ref.shape[-1]            # store only the real Cout lanes (HBM-write bound)
    o_ref[...] = out[None, :, :cs].astype(o_ref.dtype)


def _dm_kernel_noctx(xc_ref, bias_ref, win_ref, wout_ref, bout_ref, o_ref):
    """One (batch, HW-tile) per step: in-conv(+emb bias) + SiLU + out-conv."""
    xc = xc_ref[0]                  # (T, Cin)  bf16
    bias = bias_ref[0]              # (1, MC_p) f32

    h = jnp.dot(xc, win_ref[...], preferred_element_type=jnp.float32) + bias
    h = h * jax.nn.sigmoid(h)
    out = jnp.dot(h.astype(jnp.bfloat16), wout_ref[...],
                  preferred_element_type=jnp.float32) + bout_ref[...]
    cs = o_ref.shape[-1]
    o_ref[...] = out[None, :, :cs].astype(o_ref.dtype)


# ----------------------------------------------------------------------------
# pallas_call runners
# ----------------------------------------------------------------------------

def _run_diffusion_ctx(tokens, bias, bias_q, k, v, mask, kp, *, cout_store):
    B, HW, Cin = tokens.shape
    _, S_p, MC_p = k.shape
    Cout_p = kp["W_out"].shape[1]

    # per-token / fixed VMEM working-set estimates (bytes) for the tile pick.
    per_tok = (Cin * 2 * 2 + cout_store * 2 * 2        # in/out blocks, double-buf bf16
               + 3 * MC_p * 4 + 2 * S_p * 4)           # h, q, a, logits, p (f32)
    fixed = (2 * 2 * S_p * MC_p * 2                    # k, v (double-buffered bf16)
             + 2 * 2 * (2 * Cin * MC_p + MC_p * MC_p + MC_p * Cout_p)
             + 2 * 4 * (3 * MC_p + S_p + Cout_p))      # biases + mask
    tile, HW_p = _pick_hw_tile(HW, per_tok, fixed)
    tokens = _pad_to(tokens, (B, HW_p, Cin))

    weights = (kp["W_in"], kp["W_inq"], kp["W_o"], kp["W_out"], kp["b_out"])

    out = pl.pallas_call(
        _dm_kernel_ctx,
        out_shape=jax.ShapeDtypeStruct((B, HW_p, cout_store), jnp.bfloat16),
        grid=(B, HW_p // tile),
        in_specs=[
            pl.BlockSpec((1, tile, Cin), lambda b, h: (b, h, 0)),
            pl.BlockSpec((1, 1, MC_p), lambda b, h: (b, 0, 0)),
            pl.BlockSpec((1, 1, MC_p), lambda b, h: (b, 0, 0)),
            pl.BlockSpec((1, S_p, MC_p), lambda b, h: (b, 0, 0)),
            pl.BlockSpec((1, S_p, MC_p), lambda b, h: (b, 0, 0)),
            _full_spec(mask),
        ] + [_full_spec(w) for w in weights],
        out_specs=pl.BlockSpec((1, tile, cout_store), lambda b, h: (b, h, 0)),
        compiler_params=pltpu.CompilerParams(
            dimension_semantics=("parallel", "parallel"),
            vmem_limit_bytes=_VMEM_LIMIT),
    )(tokens, bias, bias_q, k, v, mask, *weights)
    return out[:, :HW]


def _run_diffusion_noctx(tokens, bias, kp, *, cout_store):
    B, HW, Cin = tokens.shape
    MC_p = kp["W_in"].shape[1]
    Cout_p = kp["W_out"].shape[1]

    per_tok = Cin * 2 * 2 + cout_store * 2 * 2 + 2 * MC_p * 4
    fixed = 2 * 2 * (Cin * MC_p + MC_p * Cout_p) + 2 * 4 * (MC_p + Cout_p)
    tile, HW_p = _pick_hw_tile(HW, per_tok, fixed)
    tokens = _pad_to(tokens, (B, HW_p, Cin))

    weights = (kp["W_in"], kp["W_out"], kp["b_out"])

    out = pl.pallas_call(
        _dm_kernel_noctx,
        out_shape=jax.ShapeDtypeStruct((B, HW_p, cout_store), jnp.bfloat16),
        grid=(B, HW_p // tile),
        in_specs=[
            pl.BlockSpec((1, tile, Cin), lambda b, h: (b, h, 0)),
            pl.BlockSpec((1, 1, MC_p), lambda b, h: (b, 0, 0)),
        ] + [_full_spec(w) for w in weights],
        out_specs=pl.BlockSpec((1, tile, cout_store), lambda b, h: (b, h, 0)),
        compiler_params=pltpu.CompilerParams(
            dimension_semantics=("parallel", "parallel"),
            vmem_limit_bytes=_VMEM_LIMIT),
    )(tokens, bias, *weights)
    return out[:, :HW]


# ----------------------------------------------------------------------------
# Glue: timestep embedding, parameter init, the DiffusionWrapper logic
# ----------------------------------------------------------------------------

def timestep_embedding(t, dim, max_period=10000.0):
    half = dim // 2
    freqs = jnp.exp(-jnp.log(max_period) * jnp.arange(half, dtype=jnp.float32) / half)
    args = t.astype(jnp.float32)[:, None] * freqs[None, :]
    return jnp.concatenate([jnp.cos(args), jnp.sin(args)], axis=-1)


def _init(key, shape, scale=0.05):
    return scale * jax.random.normal(key, shape, dtype=jnp.float32)


class DiffusionWrapperPallas:
    """JAX/Pallas mirror of imaginairy DiffusionWrapper.forward."""

    def __init__(self, conditioning_key, *, in_channels, out_channels,
                 model_channels, context_dim, adm_dim=None, key=None):
        assert conditioning_key in (None, "concat", "crossattn", "hybrid", "adm")
        assert model_channels % 2 == 0, "timestep embedding needs even channels"
        self.conditioning_key = conditioning_key
        self.model_channels = model_channels
        self.out_channels = out_channels
        ks = jax.random.split(key, 10)
        MC = model_channels
        # real (unpadded) parameters
        self.params = {
            # time-embedding MLP (tiny -> plain-JAX glue)
            "W_t1": _init(ks[0], (MC, MC)), "b_t1": jnp.zeros((MC,), jnp.float32),
            "W_t2": _init(ks[1], (MC, MC)), "b_t2": jnp.zeros((MC,), jnp.float32),
            # kernel weights (1x1 convs, cross-attn, output proj)
            "W_in": _init(ks[2], (in_channels, MC)),
            "b_in": jnp.zeros((1, MC), jnp.float32),
            "W_q": _init(ks[3], (MC, MC)),
            "W_k": _init(ks[4], (context_dim, MC)),
            "W_v": _init(ks[5], (context_dim, MC)),
            "W_o": _init(ks[6], (MC, MC)),
            "W_out": _init(ks[7], (MC, out_channels)),
            "b_out": jnp.zeros((1, out_channels), jnp.float32),
        }
        if adm_dim is not None:
            self.params["W_y"] = _init(ks[8], (adm_dim, MC))

        # Kernel-side parameters: lane-padded hidden/context/out-proj dims, bf16
        # matmul operands.  Zero padding is exact (zero weight rows/cols and
        # SiLU(0)=0 keep padded lanes at zero).  Cin is deliberately NOT padded.
        # TODO(synk): when scaling MC to real UNet widths, prefer 256-aligned
        # MC_p on v6e/v7x (256x256 MXU) and re-derive the VMEM budget per chip.
        self._mc_p = _round_up(MC, LANE)
        self._cout_p = _round_up(out_channels, LANE)
        p = self.params
        # fold attention scale 1/sqrt(MC) into the q projection, and precompute
        # W_inq = W_in @ W_q_scaled so q is computed directly from the input tile.
        self._wq_scaled = p["W_q"] * (1.0 / float(MC) ** 0.5)          # f32 (glue)
        w_inq = p["W_in"] @ self._wq_scaled                             # (Cin, MC)
        self.kparams = {
            "W_in": _pad_to(p["W_in"], (in_channels, self._mc_p)).astype(jnp.bfloat16),
            "W_inq": _pad_to(w_inq, (in_channels, self._mc_p)).astype(jnp.bfloat16),
            "W_o": _pad_to(p["W_o"], (self._mc_p, self._mc_p)).astype(jnp.bfloat16),
            "W_out": _pad_to(p["W_out"], (self._mc_p, self._cout_p)).astype(jnp.bfloat16),
            "b_out": _pad_to(p["b_out"], (1, self._cout_p)),            # f32
        }

    # --- inner synthetic diffusion model -----------------------------------
    # TODO(synk): the real inner model comes from instantiate_from_config
    # (a full UNetModel); we stand in a UNet-lite with the same interface.
    def _diffusion_model(self, x, t, context=None, y=None):
        B, C, H, W = x.shape
        HW = H * W
        p = self.params

        # time-embedding MLP (glue) + optional adm class conditioning
        te = timestep_embedding(t, self.model_channels)
        h = te @ p["W_t1"] + p["b_t1"]
        h = h * jax.nn.sigmoid(h)                      # SiLU
        emb = h @ p["W_t2"] + p["b_t2"]                # (B, MC)
        if y is not None:
            emb = emb + y @ p["W_y"]

        # fold emb into the input-conv bias (removes a per-tile broadcast add)
        bias_real = p["b_in"] + emb                                     # (B, MC)
        bias = _pad_to(bias_real, (B, self._mc_p))[:, None, :]          # (B,1,MC_p)

        # layout: NCHW -> channels-last tokens [B, HW, Cin] (real Cin, bf16)
        tokens = jnp.transpose(x, (0, 2, 3, 1)).reshape(B, HW, C).astype(jnp.bfloat16)

        if context is not None:
            S = context.shape[1]
            S_p = _round_up(S, LANE)
            # K/V hoisted out of the kernel: one batched matmul over the batch
            k = jnp.einsum("bsd,dm->bsm", context, p["W_k"])
            v = jnp.einsum("bsd,dm->bsm", context, p["W_v"])
            k = _pad_to(k, (B, S_p, self._mc_p)).astype(jnp.bfloat16)
            v = _pad_to(v, (B, S_p, self._mc_p)).astype(jnp.bfloat16)
            # additive softmax mask: 0 for real tokens, -1e30 for padded tokens
            mask = jnp.where(jnp.arange(S_p) < S, 0.0, _NEG_INF)
            mask = mask.reshape(1, S_p).astype(jnp.float32)
            # q-path bias (scale already folded into W_q_scaled)
            bias_q = _pad_to(bias_real @ self._wq_scaled, (B, self._mc_p))[:, None, :]
            out_tok = _run_diffusion_ctx(tokens, bias, bias_q, k, v, mask,
                                         self.kparams, cout_store=self.out_channels)
        else:
            out_tok = _run_diffusion_noctx(tokens, bias, self.kparams,
                                           cout_store=self.out_channels)

        # back to NCHW, restore f32 (kernel writes bf16 to halve HBM writeback)
        out = out_tok.reshape(B, H, W, self.out_channels)
        return jnp.transpose(out, (0, 3, 1, 2)).astype(jnp.float32)

    # --- exact DiffusionWrapper.forward semantics ---------------------------
    def __call__(self, x, t, c_concat=None, c_crossattn=None):
        if self.conditioning_key is None:
            out = self._diffusion_model(x, t)
        elif self.conditioning_key == "concat":
            xc = jnp.concatenate([x, *c_concat], axis=1)
            out = self._diffusion_model(xc, t)
        elif self.conditioning_key == "crossattn":
            cc = jnp.concatenate(c_crossattn, axis=1)
            out = self._diffusion_model(x, t, context=cc)
        elif self.conditioning_key == "hybrid":
            xc = jnp.concatenate([x, *c_concat], axis=1)
            cc = jnp.concatenate(c_crossattn, axis=1)
            out = self._diffusion_model(xc, t, context=cc)
        elif self.conditioning_key == "adm":
            cc = c_crossattn[0]
            out = self._diffusion_model(x, t, y=cc)
        else:
            raise NotImplementedError()
        return out


# ----------------------------------------------------------------------------
# Demo
# ----------------------------------------------------------------------------

if __name__ == "__main__":
    key = jax.random.PRNGKey(0)
    kx, kc1, kc2, kcc1, kcc2, kparams = jax.random.split(key, 6)

    B, C, H, W = 2, 4, 16, 16
    MODEL_CH = 32
    CTX_D = 32

    # inputs (hybrid conditioning: 2 concat tensors -> +2 channels,
    #         2 crossattn tensors of 4 tokens each -> 8 context tokens)
    x = jax.random.normal(kx, (B, C, H, W), dtype=jnp.float32)
    t = jnp.array([3, 7], dtype=jnp.int32)
    c_concat = [
        jax.random.normal(kc1, (B, 1, H, W), dtype=jnp.float32),
        jax.random.normal(kc2, (B, 1, H, W), dtype=jnp.float32),
    ]
    c_crossattn = [
        jax.random.normal(kcc1, (B, 4, CTX_D), dtype=jnp.float32),
        jax.random.normal(kcc2, (B, 4, CTX_D), dtype=jnp.float32),
    ]

    wrapper = DiffusionWrapperPallas(
        "hybrid",
        in_channels=C + 2,           # x channels + concatenated conditioning channels
        out_channels=C,
        model_channels=MODEL_CH,
        context_dim=CTX_D,
        key=kparams,
    )

    out = wrapper(x, t, c_concat=c_concat, c_crossattn=c_crossattn)
    out = jax.block_until_ready(out)

    assert out.shape == (B, C, H, W), out.shape
    assert bool(jnp.all(jnp.isfinite(out)))

    # also exercise the no-context path (conditioning_key="concat")
    wrapper2 = DiffusionWrapperPallas(
        "concat", in_channels=C + 2, out_channels=C,
        model_channels=MODEL_CH, context_dim=CTX_D, key=kparams)
    out2 = jax.block_until_ready(wrapper2(x, t, c_concat=c_concat))
    assert out2.shape == (B, C, H, W)
    assert bool(jnp.all(jnp.isfinite(out2)))

    print("KERNEL_OK")
</pallas_src>

<mosaic_0001>
module attributes {stable_mosaic.version = 11 : i64} {
  func.func @_dm_kernel_ctx(%arg0: i32, %arg1: i32, %arg2: memref<1x128x6xbf16, #tpu.memory_space<vmem>>, %arg3: memref<1x1x128xf32, #tpu.memory_space<vmem>>, %arg4: memref<1x1x128xf32, #tpu.memory_space<vmem>>, %arg5: memref<1x128x128xbf16, #tpu.memory_space<vmem>>, %arg6: memref<1x128x128xbf16, #tpu.memory_space<vmem>>, %arg7: memref<1x128xf32, #tpu.memory_space<vmem>>, %arg8: memref<6x128xbf16, #tpu.memory_space<vmem>>, %arg9: memref<6x128xbf16, #tpu.memory_space<vmem>>, %arg10: memref<128x128xbf16, #tpu.memory_space<vmem>>, %arg11: memref<128x128xbf16, #tpu.memory_space<vmem>>, %arg12: memref<1x128xf32, #tpu.memory_space<vmem>>, %arg13: memref<1x128x4xbf16, #tpu.memory_space<vmem>>) attributes {dimension_semantics = [#tpu.dimension_semantics<parallel>, #tpu.dimension_semantics<parallel>], iteration_bounds = array<i64: 2, 2>, scalar_prefetch = 0 : i64, scratch_operands = 0 : i64, tpu.core_type = #tpu.core_type<tc>, window_params = [{transform_indices = @transform_0, window_bounds = array<i64: 1, 128, 6>}, {transform_indices = @transform_1, window_bounds = array<i64: 1, 1, 128>}, {transform_indices = @transform_2, window_bounds = array<i64: 1, 1, 128>}, {transform_indices = @transform_3, window_bounds = array<i64: 1, 128, 128>}, {transform_indices = @transform_4, window_bounds = array<i64: 1, 128, 128>}, {pipeline_mode = #tpu.pipeline_mode<synchronous>, transform_indices = @transform_5, window_bounds = array<i64: 1, 128>}, {pipeline_mode = #tpu.pipeline_mode<synchronous>, transform_indices = @transform_6, window_bounds = array<i64: 6, 128>}, {pipeline_mode = #tpu.pipeline_mode<synchronous>, transform_indices = @transform_7, window_bounds = array<i64: 6, 128>}, {pipeline_mode = #tpu.pipeline_mode<synchronous>, transform_indices = @transform_8, window_bounds = array<i64: 128, 128>}, {pipeline_mode = #tpu.pipeline_mode<synchronous>, transform_indices = @transform_9, window_bounds = array<i64: 128, 128>}, {pipeline_mode = #tpu.pipeline_mode<synchronous>, transform_indices = @transform_10, window_bounds = array<i64: 1, 128>}, {transform_indices = @transform_11, window_bounds = array<i64: 1, 128, 4>}]} {
    %c0 = arith.constant 0 : index
    %c0_0 = arith.constant 0 : index
    %c0_1 = arith.constant 0 : index
    %0 = vector.load %arg2[%c0, %c0_0, %c0_1] : memref<1x128x6xbf16, #tpu.memory_space<vmem>>, vector<1x128x6xbf16>
    %1 = vector.shape_cast %0 : vector<1x128x6xbf16> to vector<128x6xbf16>
    %c0_2 = arith.constant 0 : index
    %c0_3 = arith.constant 0 : index
    %c0_4 = arith.constant 0 : index
    %2 = vector.load %arg3[%c0_2, %c0_3, %c0_4] : memref<1x1x128xf32, #tpu.memory_space<vmem>>, vector<1x1x128xf32>
    %3 = vector.shape_cast %2 : vector<1x1x128xf32> to vector<1x128xf32>
    %c0_5 = arith.constant 0 : index
    %c0_6 = arith.constant 0 : index
    %c0_7 = arith.constant 0 : index
    %4 = vector.load %arg4[%c0_5, %c0_6, %c0_7] : memref<1x1x128xf32, #tpu.memory_space<vmem>>, vector<1x1x128xf32>
    %5 = vector.shape_cast %4 : vector<1x1x128xf32> to vector<1x128xf32>
    %c0_8 = arith.constant 0 : index
    %c0_9 = arith.constant 0 : index
    %c0_10 = arith.constant 0 : index
    %6 = vector.load %arg5[%c0_8, %c0_9, %c0_10] : memref<1x128x128xbf16, #tpu.memory_space<vmem>>, vector<1x128x128xbf16>
    %7 = vector.shape_cast %6 : vector<1x128x128xbf16> to vector<128x128xbf16>
    %c0_11 = arith.constant 0 : index
    %c0_12 = arith.constant 0 : index
    %c0_13 = arith.constant 0 : index
    %8 = vector.load %arg6[%c0_11, %c0_12, %c0_13] : memref<1x128x128xbf16, #tpu.memory_space<vmem>>, vector<1x128x128xbf16>
    %9 = vector.shape_cast %8 : vector<1x128x128xbf16> to vector<128x128xbf16>
    %c0_14 = arith.constant 0 : index
    %c0_15 = arith.constant 0 : index
    %10 = vector.load %arg7[%c0_14, %c0_15] : memref<1x128xf32, #tpu.memory_space<vmem>>, vector<1x128xf32>
    %c0_16 = arith.constant 0 : index
    %c0_17 = arith.constant 0 : index
    %11 = vector.load %arg8[%c0_16, %c0_17] : memref<6x128xbf16, #tpu.memory_space<vmem>>, vector<6x128xbf16>
    %cst = arith.constant dense<0.000000e+00> : vector<128x128xf32>
    %12 = tpu.matmul %1, %11, %cst {dimension_numbers = #tpu.dot_dimension_numbers<[1], [0], [0], [1], [0, 0, 1, 1], [], []>} : vector<128x6xbf16>, vector<6x128xbf16>, vector<128x128xf32> -> vector<128x128xf32>
    %13 = vector.broadcast %3 : vector<1x128xf32> to vector<128x128xf32>
    %14 = arith.addf %12, %13 : vector<128x128xf32>
    %c0_18 = arith.constant 0 : index
    %c0_19 = arith.constant 0 : index
    %15 = vector.load %arg9[%c0_18, %c0_19] : memref<6x128xbf16, #tpu.memory_space<vmem>>, vector<6x128xbf16>
    %cst_20 = arith.constant dense<0.000000e+00> : vector<128x128xf32>
    %16 = tpu.matmul %1, %15, %cst_20 {dimension_numbers = #tpu.dot_dimension_numbers<[1], [0], [0], [1], [0, 0, 1, 1], [], []>} : vector<128x6xbf16>, vector<6x128xbf16>, vector<128x128xf32> -> vector<128x128xf32>
    %17 = vector.broadcast %5 : vector<1x128xf32> to vector<128x128xf32>
    %18 = arith.addf %16, %17 : vector<128x128xf32>
    %19 = arith.truncf %18 : vector<128x128xf32> to vector<128x128xbf16>
    %cst_21 = arith.constant dense<0.000000e+00> : vector<128x128xf32>
    %20 = tpu.matmul %19, %7, %cst_21 {dimension_numbers = #tpu.dot_dimension_numbers<[1], [1], [0], [0], [0, 0, 1, 0], [], []>} : vector<128x128xbf16>, vector<128x128xbf16>, vector<128x128xf32> -> vector<128x128xf32>
    %21 = vector.broadcast %10 : vector<1x128xf32> to vector<128x128xf32>
    %22 = arith.addf %20, %21 : vector<128x128xf32>
    %cst_22 = arith.constant dense<0xFF800000> : vector<128xf32>
    %23 = vector.multi_reduction <maximumf>, %22, %cst_22 [1] : vector<128x128xf32> to vector<128xf32>
    %24 = vector.shape_cast %23 : vector<128xf32> to vector<128x1xf32>
    %25 = vector.broadcast %24 : vector<128x1xf32> to vector<128x128xf32>
    %26 = arith.subf %22, %25 : vector<128x128xf32>
    %27 = math.exp %26 : vector<128x128xf32>
    %cst_23 = arith.constant dense<0.000000e+00> : vector<128xf32>
    %28 = vector.multi_reduction <add>, %27, %cst_23 [1] : vector<128x128xf32> to vector<128xf32>
    %29 = vector.shape_cast %28 : vector<128xf32> to vector<128x1xf32>
    %30 = tpu.reciprocal %29 {approx = true} : vector<128x1xf32> -> vector<128x1xf32>
    %31 = vector.broadcast %30 : vector<128x1xf32> to vector<128x128xf32>
    %32 = arith.mulf %27, %31 : vector<128x128xf32>
    %33 = arith.truncf %32 : vector<128x128xf32> to vector<128x128xbf16>
    %cst_24 = arith.constant dense<0.000000e+00> : vector<128x128xf32>
    %34 = tpu.matmul %33, %9, %cst_24 {dimension_numbers = #tpu.dot_dimension_numbers<[1], [0], [0], [1], [0, 0, 1, 1], [], []>} : vector<128x128xbf16>, vector<128x128xbf16>, vector<128x128xf32> -> vector<128x128xf32>
    %35 = arith.truncf %34 : vector<128x128xf32> to vector<128x128xbf16>
    %c0_25 = arith.constant 0 : index
    %c0_26 = arith.constant 0 : index
    %36 = vector.load %arg10[%c0_25, %c0_26] : memref<128x128xbf16, #tpu.memory_space<vmem>>, vector<128x128xbf16>
    %cst_27 = arith.constant dense<0.000000e+00> : vector<128x128xf32>
    %37 = tpu.matmul %35, %36, %cst_27 {dimension_numbers = #tpu.dot_dimension_numbers<[1], [0], [0], [1], [0, 0, 1, 1], [], []>} : vector<128x128xbf16>, vector<128x128xbf16>, vector<128x128xf32> -> vector<128x128xf32>
    %38 = arith.addf %14, %37 : vector<128x128xf32>
    %39 = arith.negf %38 : vector<128x128xf32>
    %40 = math.exp %39 : vector<128x128xf32>
    %cst_28 = arith.constant 1.000000e+00 : f32
    %41 = vector.broadcast %cst_28 : f32 to vector<128x128xf32>
    %42 = arith.addf %41, %40 : vector<128x128xf32>
    %43 = arith.divf %41, %42 : vector<128x128xf32>
    %44 = arith.mulf %38, %43 : vector<128x128xf32>
    %45 = arith.truncf %44 : vector<128x128xf32> to vector<128x128xbf16>
    %c0_29 = arith.constant 0 : index
    %c0_30 = arith.constant 0 : index
    %46 = vector.load %arg11[%c0_29, %c0_30] : memref<128x128xbf16, #tpu.memory_space<vmem>>, vector<128x128xbf16>
    %cst_31 = arith.constant dense<0.000000e+00> : vector<128x128xf32>
    %47 = tpu.matmul %45, %46, %cst_31 {dimension_numbers = #tpu.dot_dimension_numbers<[1], [0], [0], [1], [0, 0, 1, 1], [], []>} : vector<128x128xbf16>, vector<128x128xbf16>, vector<128x128xf32> -> vector<128x128xf32>
    %c0_32 = arith.constant 0 : index
    %c0_33 = arith.constant 0 : index
    %48 = vector.load %arg12[%c0_32, %c0_33] : memref<1x128xf32, #tpu.memory_space<vmem>>, vector<1x128xf32>
    %49 = vector.broadcast %48 : vector<1x128xf32> to vector<128x128xf32>
    %50 = arith.addf %47, %49 : vector<128x128xf32>
    %51 = vector.extract_strided_slice %50 {offsets = [0, 0], sizes = [128, 4], strides = [1, 1]} : vector<128x128xf32> to vector<128x4xf32>
    %52 = vector.shape_cast %51 : vector<128x4xf32> to vector<1x128x4xf32>
    %53 = arith.truncf %52 : vector<1x128x4xf32> to vector<1x128x4xbf16>
    %c0_34 = arith.constant 0 : index
    %c0_35 = arith.constant 0 : index
    %c0_36 = arith.constant 0 : index
    %54 = vector.load %arg13[%c0_34, %c0_35, %c0_36] : memref<1x128x4xbf16, #tpu.memory_space<vmem>>, vector<1x128x4xbf16>
    tpu.vector_store %arg13[%c0_34, %c0_35, %c0_36], %53 {strides = array<i32>} : memref<1x128x4xbf16, #tpu.memory_space<vmem>>, vector<1x128x4xbf16>,
    return
  }
  func.func @transform_0(%arg0: i32, %arg1: i32) -> (i32, i32, i32) {
    %c0_i32 = arith.constant 0 : i32
    %c0_i32_0 = arith.constant 0 : i32
    return %arg0, %arg1, %c0_i32 : i32, i32, i32
  }
  func.func @transform_1(%arg0: i32, %arg1: i32) -> (i32, i32, i32) {
    %c0_i32 = arith.constant 0 : i32
    %c0_i32_0 = arith.constant 0 : i32
    %c0_i32_1 = arith.constant 0 : i32
    return %arg0, %c0_i32, %c0_i32_0 : i32, i32, i32
  }
  func.func @transform_2(%arg0: i32, %arg1: i32) -> (i32, i32, i32) {
    %c0_i32 = arith.constant 0 : i32
    %c0_i32_0 = arith.constant 0 : i32
    %c0_i32_1 = arith.constant 0 : i32
    return %arg0, %c0_i32, %c0_i32_0 : i32, i32, i32
  }
  func.func @transform_3(%arg0: i32, %arg1: i32) -> (i32, i32, i32) {
    %c0_i32 = arith.constant 0 : i32
    %c0_i32_0 = arith.constant 0 : i32
    %c0_i32_1 = arith.constant 0 : i32
    return %arg0, %c0_i32, %c0_i32_0 : i32, i32, i32
  }
  func.func @transform_4(%arg0: i32, %arg1: i32) -> (i32, i32, i32) {
    %c0_i32 = arith.constant 0 : i32
    %c0_i32_0 = arith.constant 0 : i32
    %c0_i32_1 = arith.constant 0 : i32
    return %arg0, %c0_i32, %c0_i32_0 : i32, i32, i32
  }
  func.func @transform_5(%arg0: i32, %arg1: i32) -> (i32, i32) {
    %c0_i32 = arith.constant 0 : i32
    %c0_i32_0 = arith.constant 0 : i32
    %c0_i32_1 = arith.constant 0 : i32
    return %c0_i32, %c0_i32_0 : i32, i32
  }
  func.func @transform_6(%arg0: i32, %arg1: i32) -> (i32, i32) {
    %c0_i32 = arith.constant 0 : i32
    %c0_i32_0 = arith.constant 0 : i32
    %c0_i32_1 = arith.constant 0 : i32
    return %c0_i32, %c0_i32_0 : i32, i32
  }
  func.func @transform_7(%arg0: i32, %arg1: i32) -> (i32, i32) {
    %c0_i32 = arith.constant 0 : i32
    %c0_i32_0 = arith.constant 0 : i32
    %c0_i32_1 = arith.constant 0 : i32
    return %c0_i32, %c0_i32_0 : i32, i32
  }
  func.func @transform_8(%arg0: i32, %arg1: i32) -> (i32, i32) {
    %c0_i32 = arith.constant 0 : i32
    %c0_i32_0 = arith.constant 0 : i32
    %c0_i32_1 = arith.constant 0 : i32
    return %c0_i32, %c0_i32_0 : i32, i32
  }
  func.func @transform_9(%arg0: i32, %arg1: i32) -> (i32, i32) {
    %c0_i32 = arith.constant 0 : i32
    %c0_i32_0 = arith.constant 0 : i32
    %c0_i32_1 = arith.constant 0 : i32
    return %c0_i32, %c0_i32_0 : i32, i32
  }
  func.func @transform_10(%arg0: i32, %arg1: i32) -> (i32, i32) {
    %c0_i32 = arith.constant 0 : i32
    %c0_i32_0 = arith.constant 0 : i32
    %c0_i32_1 = arith.constant 0 : i32
    return %c0_i32, %c0_i32_0 : i32, i32
  }
  func.func @transform_11(%arg0: i32, %arg1: i32) -> (i32, i32, i32) {
    %c0_i32 = arith.constant 0 : i32
    %c0_i32_0 = arith.constant 0 : i32
    return %arg0, %arg1, %c0_i32 : i32, i32, i32
  }
}

</mosaic_0001>

<bundles_post_ra>
// kernel: tpu_custom_call.1
= control target key start
LH: loop header
LB: loop body
LE: loop exit
PB: predicated region body
PF: predicated region fallthrough
CT: control target
= control target key end

     0   :  { %16 = vsyncpa [#allocation3], 0  ;;  %s3276_s0 = inlined_call_operand.vmem [shape: bf16[2,256,6], index: 0, kind: input, shape index: {}]   ;;  %s3277_s1 = inlined_call_operand.vmem [shape: f32[2,1,128], index: 1, kind: input, shape index: {}]   ;;  %s3278_s2 = inlined_call_operand.vmem [shape: f32[2,1,128], index: 2, kind: input, shape index: {}]   ;;  %s3279_s3 = inlined_call_operand.vmem [shape: bf16[2,128,128], index: 3, kind: input, shape index: {}]   ;;  %s3280_s4 = inlined_call_operand.vmem [shape: bf16[2,128,128], index: 4, kind: input, shape index: {}]   ;;  %s3281_s5 = inlined_call_operand.vmem [shape: f32[1,128], index: 5, kind: input, shape index: {}]   ;;  %s3282_s6 = inlined_call_operand.vmem [shape: bf16[6,128], index: 6, kind: input, shape index: {}]   ;;  %s3283_s7 = inlined_call_operand.vmem [shape: bf16[6,128], index: 7, kind: input, shape index: {}]   ;;  %s3284_s8 = inlined_call_operand.hbm [shape: bf16[128,128], index: 8, kind: input, shape index: {}]   ;;  %s3285_s9 = inlined_call_operand.hbm [shape: bf16[128,128], index: 9, kind: input, shape index: {}]   ;;  %s3286_s10 = inlined_call_operand.vmem [shape: f32[1,128], index: 10, kind: input, shape index: {}]   ;;  %s3287_s11 = inlined_call_operand.vmem [shape: bf16[2,256,4], index: 11, kind: output, shape index: {}]  }
   0x1   :  { %17 = vsyncpa [#allocation5], 0  ;;  %s2830_s17 = smov 0   ;;  %s2832_s18 = smov 0  }
   0x2   :  { %s2834_s19 = smov 0   ;;  %s2836_s20 = smov 0  }
   0x3   :  { %s2838_s21 = smov 0  }
   0x4 LB: > { %3294 = sst [smem:[#allocation8_spill]] %s2756_s19  ;;  %s2020_s22 = sadd.s32 4294967295, %s2764_s21   ;;  %s2764_s21 = sphi %s2838_s21, %s23_s21   ;;  %s2760_s20 = sphi %s2836_s20, %s3308_s20   ;;  %s2756_s19 = sphi %s2834_s19, %s3307_s19   ;;  %s2752_s18 = sphi %s2832_s18, %s3306_s18   ;;  %s2748_s17 = sphi %s2830_s17, %s3305_s17  }
   0x5   : > { %3295 = sst [smem:[#allocation9_spill]] %s2760_s20  ;;  %s32_s23 = sadd.s32 1, %s2756_s19 }
   0x6   : > { %3296 = sst [smem:[#allocation10_spill]] %s2764_s21  ;;  %p33_p0 = scmp.ge.s32.totalorder %s32_s23, 2 }
   0x7   : > { %s35_s24 = sadd.s32 1, %s2760_s20  ;;  %p2022_p1 = scmp.ge.s32.totalorder %s2764_s21, 1 }
   0x8   : > { %p326_p2 = scmp.lt.s32.totalorder %s2764_s21, 5  ;;  %s3310_s23 = smov (%p33_p0, %s32_s23), 0 }
   0x9   : > { %3297 = sst [smem:[#allocation11_spill]] %s3310_s23  ;;  %s3312_s24 = smov (!%p33_p0, %s35_s24), %s2760_s20 }
   0xa   : > { %p2863_p3 = pnand %p2022_p1, %p326_p2  ;;  %p37_p4 = scmp.ge.s32.totalorder %s3312_s24, 2 }
   0xb   : > { %p2867_p5 = scmp.eq.s32.totalorder %s2020_s22, 0  ;;  %s2766_s27 = smov [#allocation2]  }
   0xc   : > { %s3298_s25 = scalar_select %p2863_p3, 1, 0 }
   0xd   : > { %s3299_s26 = scalar_select %p2867_p5, 1, 0 }
   0xe   : > { %p2439_p6 = pneg %p2863_p3  ;;  %s3314_s24 = smov (%p37_p4, %s3312_s24), 0 }
   0xf   : > { %3300 = sst [smem:[#allocation12_spill]] %s3314_s24  ;;  %s347_s28 = sshll.u32 %s2766_s27, 4  ;;  %s348_s28 = int_to_ptr.vmem [resolvable:$true] %s347_s28 }
  0x10   : > { %p2877_p7 = pnand %p2867_p5, %p2439_p6  ;;  %s2662_s13 = scalar_lea.hbm %s3284_s8, 1024 }
  0x11   : > { %p2663_p8 = scmp.ne.s32.totalorder %s3284_s8, %s2662_s13  ;;  %p2669_p12 = scmp.lt.u32.totalorder %s2662_s13, %s3284_s8 }
  0x12   : > { %p2664_p9 = pneg %p2877_p7 }
  0x14   : > { %p2665_p10 = pnand %p2664_p9, %p2663_p8 }
  0x16   : > { %p2666_p11 = pneg %p2665_p10 }
  0x18   : > { %p2671_p13 = pnand %p2669_p12, %p2666_p11 }
  0x1a   : > { %2674 = shalt.err (!%p2671_p13)
}
  0x1b   : > { %s2675_s27 = scalar_lea.vmem %s348_s28, 1024  ;;  %p2683_p4 = scmp.lt.s32.totalorder %s348_s28, %s348_s28 }
  0x1c   : > { %p2676_p0 = scmp.ne.s32.totalorder %s348_s28, %s2675_s27  ;;  %p2684_p6 = scmp.lt.s32.totalorder %s2675_s27, %s2675_s27 }
  0x1e   : > { %p2678_p1 = pnand %p2676_p0, %p2664_p9  ;;  %p2685_p5 = por %p2684_p6, %p2683_p4 }
  0x20   : > { %p2679_p2 = pneg %p2678_p1 }
  0x22   : > { %p2686_p3 = pnand %p2685_p5, %p2679_p2 }
  0x24   : > { %2689 = shalt.err (!%p2686_p3)
}
  0x25   : > { %s2767_s30 = smov 64   ;;  %s2768_s12 = smov 4  }
  0x26   : > { %2442 = dma.hbm_to_vmem [thread:$0]  (!%p2877_p7), %s3284_s8, 1024, %s348_s28, [#allocation3], %s2767_s30, %s2767_s30, %s2768_s12  }
  0x27   : > { %s2769_s15 = smov [#allocation4]   ;;  %s2690_s23 = scalar_lea.hbm %s3285_s9, 1024 }
  0x28   : > { %s360_s16 = sshll.u32 %s2769_s15, 4  ;;  %p2691_p3 = scmp.ne.s32.totalorder %s3285_s9, %s2690_s23  ;;  %s361_s16 = int_to_ptr.vmem [resolvable:$true] %s360_s16 }
  0x29   : > { %p2697_p10 = scmp.lt.u32.totalorder %s2690_s23, %s3285_s9 }
  0x2a   : > { %p2693_p5 = pnand %p2691_p3, %p2664_p9 }
  0x2c   : > { %p2694_p8 = pneg %p2693_p5 }
  0x2e   : > { %p2699_p11 = pnand %p2697_p10, %p2694_p8 }
  0x30   : > { %2702 = shalt.err (!%p2699_p11)
}
  0x31   : > { %s2703_s28 = scalar_lea.vmem %s361_s16, 1024  ;;  %p2711_p1 = scmp.lt.s32.totalorder %s361_s16, %s361_s16 }
  0x32   : > { %p2704_p12 = scmp.ne.s32.totalorder %s361_s16, %s2703_s28  ;;  %p2712_p2 = scmp.lt.s32.totalorder %s2703_s28, %s2703_s28 }
  0x34   : > { %p2706_p13 = pnand %p2704_p12, %p2664_p9  ;;  %p2713_p4 = por %p2712_p2, %p2711_p1 }
  0x36   : > { %p2707_p0 = pneg %p2706_p13 }
  0x38   : > { %p2714_p6 = pnand %p2713_p4, %p2707_p0 }
  0x3a   : > { %2717 = shalt.err (!%p2714_p6)
}
  0x3b   : > { %2445 = dma.hbm_to_vmem [thread:$0]  (!%p2877_p7), %s3285_s9, 1024, %s361_s16, [#allocation5], %s2767_s30, %s2767_s30, %s2768_s12  }
  0x3c   : > { %p3302_p3 = scmp.ne.s32.totalorder %s3298_s25, 0 }
  0x3d   : > { %p3303_p5 = scmp.ne.s32.totalorder (!%p3302_p3), %s3299_s26, 0 }
  0x3e   : > { %420 = sbr.rel (%p3302_p3) target bundleno = 1549 (0x60d), region = 64 }
  0x45   : > { %2739 = dma.done.wait (%p3303_p5), [#allocation3], 1024  }
  0x46   : > { %2741 = vsyncadd (%p3303_p5), [#allocation3], 4294966272 }
  0x47   : > { %2743 = dma.done.wait (%p3303_p5), [#allocation5], 1024  }
  0x48   : > { %2745 = vsyncadd (%p3303_p5), [#allocation5], 4294966272  ;;  %s2029_s19 = sshll.u32 %s2748_s17, 4  ;;  %p489_p7 = scmp.lt.s32.totalorder %s2752_s18, 1  ;;  %vm648_vm0 = vcmask 1042432   ;;  %vm623_vm1 = vcmask 48128  }
  0x49   : > { %p491_p9 = scmp.lt.s32.totalorder %s2029_s19, 31  ;;  %v749_v0 = vld [vmem:[%s3283_s7] sm:$0x7]  ;;  %vm1849_vm2 = vcmask 27648  }
  0x4a   : > { %s3316_s18 = smov (!%p489_p7, %s2752_s18), 1  ;;  %v576_v1 = vld [vmem:[%s3282_s6] sm:$0x7]  ;;  %2430 = vmatprep.subr.msk.bf16.mxu1 %vm648_vm0, %v749_v0  ;;  %v757_v2 = vsel %vm648_vm0, %v749_v0, 0 }
  0x4b   : > { %s3318_s19 = smov (!%p491_p9, %s2029_s19), 31  ;;  %s2030_s21 = sshll.u32 %s3316_s18, 5  ;;  %2429 = vmatprep.subr.msk.bf16.mxu0 %vm648_vm0, %v576_v1  ;;  %2252 = vmatpush3.bf16.msra.mxu1 %v757_v2  ;;  %v650_v5 = vsel %vm648_vm0, %v576_v1, 0  ;;  %v2065_v61 = vld [vmem:[%s3281_s5] ss:$0 sm:$0xff] }
  0x4c   : > { %s2133_s23 = sshll.u32 %s3316_s18, 6  ;;  %s2940_s25 = sadd.s32 %s2030_s21, %s3318_s19  ;;  %2234 = vmatpush3.bf16.msra.mxu0 %v650_v5 }
  0x4d   : > { %s2031_s26 = sshll.u32 %s2940_s25, 2  ;;  %s2948_s30 = scalar_lea.vmem %s3279_s3, %s2133_s23 }
  0x4e   : > { %s2958_s16 = scalar_lea.vmem %s3276_s0, %s2031_s26  ;;  %v2502_v9 = vld [vmem:[%s2948_s30] sm:$0xff]   ;;  %v2503_v10 = vld [vmem:[%s2948_s30 + $0x8] sm:$0xff]   ;;  %v2504_v12 = vld [vmem:[%s2948_s30 + $0x10] sm:$0xff]   ;;  %s503_s24 = scalar_lea.vmem %s3278_s2, %s3316_s18 }
  0x4f   : > { %v2494_v3 = vld [vmem:[%s2958_s16] sm:$0xff]   ;;  %v2495_v4 = vld [vmem:[%s2958_s16 + $0x8] sm:$0xff]   ;;  %v2496_v6 = vld [vmem:[%s2958_s16 + $0x10] sm:$0xff]   ;;  %2269 = vmatprep.subr.bf16.mxu0 %v2502_v9  ;;  %s500_s13 = scalar_lea.vmem %s3277_s1, %s3316_s18  ;;  %s3227_s22 = scalar_lea.vmem %s3287_s11, %s2031_s26 }
  0x50   : > { %2253 = vmatprep.mubr.msk.bf16.mxu1 %vm623_vm1, %v2494_v3  ;;  %2235 = vmatprep.mubr.msk.bf16.mxu0 %vm623_vm1, %v2494_v3  ;;  %v2497_v7 = vld [vmem:[%s2958_s16 + $0x18] sm:$0xff]   ;;  %v2498_v8 = vld [vmem:[%s2958_s16 + $0x20] sm:$0xff]   ;;  %v2499_v11 = vld [vmem:[%s2958_s16 + $0x28] sm:$0xff]  }
  0x51   : > { %2254 = vmatmul.mubr.msk.bf16.vlgmr.msra.gmra.mrb[0].mxu1 %vm623_vm1, %v2495_v4  ;;  %2236 = vmatmul.mubr.msk.bf16.vlgmr.msra.gmra.mrb[0].mxu0 %vm623_vm1, %v2495_v4  ;;  %v2500_v13 = vld [vmem:[%s2958_s16 + $0x30] sm:$0xff]   ;;  %v2501_v14 = vld [vmem:[%s2958_s16 + $0x38] sm:$0xff]   ;;  %v2506_v16 = vld [vmem:[%s2948_s30 + $0x20] sm:$0xff]  }
  0x52   : > { %2257 = vmatprep.mubr.msk.bf16.mxu1 %vm623_vm1, %v2496_v6  ;;  %2239 = vmatprep.mubr.msk.bf16.mxu0 %vm623_vm1, %v2496_v6  ;;  %v2505_v15 = vld [vmem:[%s2948_s30 + $0x18] sm:$0xff]   ;;  %v2507_v17 = vld [vmem:[%s2948_s30 + $0x28] sm:$0xff]   ;;  %v2508_v18 = vld [vmem:[%s2948_s30 + $0x30] sm:$0xff]  }
  0x53   : > { %v2509_v19 = vld [vmem:[%s2948_s30 + $0x38] sm:$0xff]   ;;  %v2056_v21 = vld [vmem:[%s503_s24] ss:$0 sm:$0xff]  ;;  %s3046_s30 = scalar_lea.vmem %s3280_s4, %s2133_s23 }
  0x55   : > { %2270 = vmatpush3.bf16.xpose.msra.mxu0 %v2502_v9 }
  0x56   : > { %2271 = vmatprep.subr.bf16.mxu0 %v2503_v10 }
  0x59   : > { %2258 = vmatmul.mubr.msk.bf16.gmra.mrb[4].mxu1 %vm623_vm1, %v2497_v7  ;;  %2240 = vmatmul.mubr.msk.bf16.gmra.mrb[4].mxu0 %vm623_vm1, %v2497_v7 }
  0x5a   : > { %2261 = vmatprep.mubr.msk.bf16.mxu1 %vm623_vm1, %v2498_v8  ;;  %2243 = vmatprep.mubr.msk.bf16.mxu0 %vm623_vm1, %v2498_v8 }
  0x5d   : > { %2272 = vmatpush3.bf16.xpose.msra.mxu0 %v2503_v10 }
  0x5e   : > { %2273 = vmatprep.subr.bf16.mxu0 %v2504_v12 }
  0x61   : > { %2262 = vmatmul.mubr.msk.bf16.gmra.mrb[8].mxu1 %vm623_vm1, %v2499_v11  ;;  %2244 = vmatmul.mubr.msk.bf16.gmra.mrb[8].mxu0 %vm623_vm1, %v2499_v11 }
  0x62   : > { %2265 = vmatprep.mubr.msk.bf16.mxu1 %vm623_vm1, %v2500_v13  ;;  %2247 = vmatprep.mubr.msk.bf16.mxu0 %vm623_vm1, %v2500_v13 }
  0x65   : > { %2274 = vmatpush3.bf16.xpose.msra.mxu0 %v2504_v12 }
  0x66   : > { %2275 = vmatprep.subr.bf16.mxu0 %v2505_v15 }
  0x69   : > { %2266 = vmatmul.mubr.msk.bf16.gmra.mrb[12].mxu1 %vm623_vm1, %v2501_v14  ;;  %2248 = vmatmul.mubr.msk.bf16.gmra.mrb[12].mxu0 %vm623_vm1, %v2501_v14 }
  0x6d   : > { %2276 = vmatpush3.bf16.xpose.msra.mxu0 %v2505_v15 }
  0x6e   : > { %2277 = vmatprep.subr.bf16.mxu0 %v2506_v16 }
  0x75   : > { %2278 = vmatpush3.bf16.xpose.msra.mxu0 %v2506_v16 }
  0x76   : > { %2279 = vmatprep.subr.bf16.mxu0 %v2507_v17 }
  0x7d   : > { %2280 = vmatpush3.bf16.xpose.msra.mxu0 %v2507_v17 }
  0x7e   : > { %2281 = vmatprep.subr.bf16.mxu0 %v2508_v18 }
  0x85   : > { %2282 = vmatpush3.bf16.xpose.msra.mxu0 %v2508_v18 }
  0x86   : > { %2283 = vmatprep.subr.bf16.mxu0 %v2509_v19 }
  0x8d   : > { %2284 = vmatpush3.bf16.xpose.msra.mxu0 %v2509_v19 }
 0x124   : > { %v2255_v20 = vpop.f32.mrb[0].mxu1 }
 0x125   : > { %v793_v22 = vpop.f32.mrb[1].mxu1  ;;  %v802_v24 = vadd.f32 %v2255_v20, %v2056_v21 }
 0x126   : > { %v2256_v23 = vpop.f32.mrb[2].mxu1  ;;  %v794_v27 = vadd.f32 %v2056_v21, %v793_v22 }
 0x127   : > { %v805_v25 = vadd.f32 %v2256_v23, %v2056_v21  ;;  %v796_v26 = vpop.f32.mrb[3].mxu1 }
 0x128   : > { %v797_v28 = vadd.f32 %v2056_v21, %v796_v26 }
 0x129   : > { %v857_v29 = vpack.c.bf16 %v805_v25, %v802_v24 }
 0x12a   : > { %v856_v30 = vpack.c.bf16 %v797_v28, %v794_v27 }
 0x12c   : > { %v2259_v31 = vpop.f32.mrb[4].mxu1  ;;  %2285 = vmatprep.mubr.bf16.mxu0 %v856_v30  ;;  %v2510_v30 = vld [vmem:[%s3046_s30] sm:$0xff]  }
 0x12d   : > { %v818_v32 = vadd.f32 %v2259_v31, %v2056_v21  ;;  %v809_v33 = vpop.f32.mrb[5].mxu1  ;;  %2286 = vmatmul.mubr.bf16.vlgmr.msra.gmra.mrb[16].mxu0 %v857_v29  ;;  %v2511_v31 = vld [vmem:[%s3046_s30 + $0x8] sm:$0xff]   ;;  %2301 = vmatprep.subr.bf16.mxu1 %v2510_v30 }
 0x12e   : > { %v810_v34 = vadd.f32 %v2056_v21, %v809_v33  ;;  %v2260_v35 = vpop.f32.mrb[6].mxu1  ;;  %2302 = vmatpush3.bf16.msra.mxu1 %v2510_v30 }
 0x12f   : > { %v821_v36 = vadd.f32 %v2260_v35, %v2056_v21  ;;  %v812_v37 = vpop.f32.mrb[7].mxu1  ;;  %2303 = vmatprep.subr.bf16.mxu1 %v2511_v31 }
 0x130   : > { %v813_v38 = vadd.f32 %v2056_v21, %v812_v37 }
 0x131   : > { %v859_v39 = vpack.c.bf16 %v821_v36, %v818_v32  ;;  %v2512_v32 = vld [vmem:[%s3046_s30 + $0x10] sm:$0xff]  }
 0x132   : > { %v858_v40 = vpack.c.bf16 %v813_v38, %v810_v34  ;;  %2304 = vmatpush3.bf16.msra.mxu1 %v2511_v31 }
 0x133   : > { %2305 = vmatprep.subr.bf16.mxu1 %v2512_v32 }
 0x134   : > { %v2263_v41 = vpop.f32.mrb[8].mxu1  ;;  %2289 = vmatprep.mubr.bf16.mxu0 %v858_v40 }
 0x135   : > { %v834_v42 = vadd.f32 %v2263_v41, %v2056_v21  ;;  %v825_v43 = vpop.f32.mrb[9].mxu1  ;;  %2290 = vmatmul.mubr.bf16.gmra.mrb[20].mxu0 %v859_v39 }
 0x136   : > { %v826_v44 = vadd.f32 %v2056_v21, %v825_v43  ;;  %v2264_v45 = vpop.f32.mrb[10].mxu1  ;;  %2306 = vmatpush3.bf16.msra.mxu1 %v2512_v32  ;;  %v2515_v32 = vld [vmem:[%s3046_s30 + $0x28] sm:$0xff]  }
 0x137   : > { %v837_v46 = vadd.f32 %v2264_v45, %v2056_v21  ;;  %v828_v47 = vpop.f32.mrb[11].mxu1 }
 0x138   : > { %v829_v48 = vadd.f32 %v2056_v21, %v828_v47 }
 0x139   : > { %v861_v49 = vpack.c.bf16 %v837_v46, %v834_v42 }
 0x13a   : > { %v860_v50 = vpack.c.bf16 %v829_v48, %v826_v44 }
 0x13c   : > { %v2267_v51 = vpop.f32.mrb[12].mxu1  ;;  %2293 = vmatprep.mubr.bf16.mxu0 %v860_v50 }
 0x13d   : > { %v850_v52 = vadd.f32 %v2267_v51, %v2056_v21  ;;  %v841_v53 = vpop.f32.mrb[13].mxu1  ;;  %2294 = vmatmul.mubr.bf16.gmra.mrb[24].mxu0 %v861_v49 }
 0x13e   : > { %v842_v54 = vadd.f32 %v2056_v21, %v841_v53  ;;  %v2268_v55 = vpop.f32.mrb[14].mxu1 }
 0x13f   : > { %v853_v56 = vadd.f32 %v2268_v55, %v2056_v21  ;;  %v844_v57 = vpop.f32.mrb[15].mxu1 }
 0x140   : > { %v845_v58 = vadd.f32 %v2056_v21, %v844_v57 }
 0x141   : > { %v863_v59 = vpack.c.bf16 %v853_v56, %v850_v52 }
 0x142   : > { %v862_v60 = vpack.c.bf16 %v845_v58, %v842_v54 }
 0x144   : > { %2297 = vmatprep.mubr.bf16.mxu0 %v862_v60 }
 0x145   : > { %2298 = vmatmul.mubr.bf16.gmra.mrb[28].mxu0 %v863_v59 }
 0x200   : > { %v2287_v62 = vpop.f32.mrb[16].mxu0 }
 0x201   : > { %v3002_v63 = vadd.f32 %v2287_v62, %v2065_v61  ;;  %v952_v0 = vpop.f32.mrb[17].mxu0 }
 0x202   : > { %v953_v1 = vadd.f32 %v2065_v61, %v952_v0  ;;  %v2288_v2 = vpop.f32.mrb[18].mxu0 }
 0x203   : > { %1019 = vmax.xlane.f32.xlu1 %v3002_v63  ;;  %v955_v3 = vpop.f32.mrb[19].mxu0  ;;  %v3005_v4 = vadd.f32 %v2288_v2, %v2065_v61 }
 0x204   : > { %1015 = vmax.xlane.f32.xlu0 %v953_v1  ;;  %v956_v5 = vadd.f32 %v2065_v61, %v955_v3 }
 0x207   : > { %1021 = vmax.xlane.f32.xlu1 %v3005_v4 }
 0x208   : > { %v2291_v6 = vpop.f32.mrb[20].mxu0  ;;  %1017 = vmax.xlane.f32.xlu0 %v956_v5 }
 0x209   : > { %v968_v7 = vpop.f32.mrb[21].mxu0  ;;  %v3010_v12 = vadd.f32 %v2291_v6, %v2065_v61 }
 0x20a   : > { %v969_v8 = vadd.f32 %v2065_v61, %v968_v7  ;;  %v2292_v9 = vpop.f32.mrb[22].mxu0 }
 0x20b   : > { %v971_v10 = vpop.f32.mrb[23].mxu0  ;;  %v3013_v13 = vadd.f32 %v2292_v9, %v2065_v61 }
 0x20c   : > { %v3008_v11 = vadd.f32 %v2065_v61, %v971_v10  ;;  %1023 = vmax.xlane.f32.xlu0 %v969_v8 }
 0x20e   : > { %1025 = vmax.xlane.f32.xlu1 %v3008_v11 }
 0x210   : > { %v2295_v14 = vpop.f32.mrb[24].mxu0  ;;  %1027 = vmax.xlane.f32.xlu0 %v3010_v12 }
 0x211   : > { %v984_v15 = vpop.f32.mrb[25].mxu0  ;;  %v3022_v20 = vadd.f32 %v2295_v14, %v2065_v61 }
 0x212   : > { %v3016_v16 = vadd.f32 %v2065_v61, %v984_v15  ;;  %v2296_v17 = vpop.f32.mrb[26].mxu0  ;;  %1029 = vmax.xlane.f32.xlu1 %v3013_v13 }
 0x213   : > { %v987_v18 = vpop.f32.mrb[27].mxu0  ;;  %v3025_v21 = vadd.f32 %v2296_v17, %v2065_v61 }
 0x214   : > { %v3019_v19 = vadd.f32 %v2065_v61, %v987_v18  ;;  %1031 = vmax.xlane.f32.xlu0 %v3016_v16 }
 0x216   : > { %1033 = vmax.xlane.f32.xlu1 %v3019_v19 }
 0x218   : > { %v2299_v22 = vpop.f32.mrb[28].mxu0  ;;  %1035 = vmax.xlane.f32.xlu0 %v3022_v20 }
 0x219   : > { %v1000_v23 = vpop.f32.mrb[29].mxu0  ;;  %v3034_v28 = vadd.f32 %v2299_v22, %v2065_v61  ;;  %v2513_v22 = vld [vmem:[%s3046_s30 + $0x18] sm:$0xff]  }
 0x21a   : > { %v3028_v24 = vadd.f32 %v2065_v61, %v1000_v23  ;;  %v2300_v25 = vpop.f32.mrb[30].mxu0  ;;  %1037 = vmax.xlane.f32.xlu1 %v3025_v21  ;;  %2307 = vmatprep.subr.bf16.mxu1 %v2513_v22 }
 0x21b   : > { %v1003_v26 = vpop.f32.mrb[31].mxu0  ;;  %v3037_v29 = vadd.f32 %v2300_v25, %v2065_v61  ;;  %2308 = vmatpush3.bf16.msra.mxu1 %v2513_v22 }
 0x21c   : > { %v3031_v27 = vadd.f32 %v2065_v61, %v1003_v26  ;;  %1039 = vmax.xlane.f32.xlu0 %v3028_v24 }
 0x21e   : > { %1041 = vmax.xlane.f32.xlu1 %v3031_v27 }
 0x220   : > { %1043 = vmax.xlane.f32.xlu0 %v3034_v28 }
 0x222   : > { %1045 = vmax.xlane.f32.xlu1 %v3037_v29 }
 0x290   : > { %v1020_v33 = vpop.xlane.xlu1 %1019 }
 0x291   : > { %v1049_v34 = vsub.f32 %v3002_v63, %v1020_v33  ;;  %v1016_v35 = vpop.xlane.xlu0 %1015 }
 0x292   : > { %v1047_v36 = vsub.f32 %v953_v1, %v1016_v35  ;;  %v2516_v35 = vld [vmem:[%s3046_s30 + $0x30] sm:$0xff]  }
 0x293   : > { %v1067_v39 = vmul.f32 1.442695, %v1049_v34 }
 0x294   : > { %v1063_v37 = vmul.f32 1.442695, %v1047_v36  ;;  %v1022_v38 = vpop.xlane.xlu1 %1021 }
 0x295   : > { %v1050_v40 = vsub.f32 %v3005_v4, %v1022_v38  ;;  %v1018_v41 = vpop.xlane.xlu0 %1017  ;;  %v2518_v38 = vld [vmem:[#allocation2] sm:$0xff]  }
 0x296   : > { %2534 = vpow2.f32 %v1063_v37  ;;  %v1048_v42 = vsub.f32 %v956_v5, %v1018_v41  ;;  %v2517_v37 = vld [vmem:[%s3046_s30 + $0x38] sm:$0xff]   ;;  %2333 = vmatprep.subr.bf16.mxu0 %v2518_v38 }
 0x297   : > { %2536 = vpow2.f32 %v1067_v39  ;;  %v1069_v44 = vmul.f32 1.442695, %v1050_v40  ;;  %v2519_v39 = vld [vmem:[#allocation2 + $0x8] sm:$0xff]   ;;  %2334 = vmatpush3.bf16.msra.mxu0 %v2518_v38  ;;  %v2520_v40 = vld [vmem:[#allocation2 + $0x10] sm:$0xff]   ;;  %v2521_v41 = vld [vmem:[#allocation2 + $0x18] sm:$0xff]  }
 0x298   : > { %v1065_v43 = vmul.f32 1.442695, %v1048_v42  ;;  %2335 = vmatprep.subr.bf16.mxu0 %v2519_v39  ;;  %v2522_v42 = vld [vmem:[#allocation2 + $0x20] sm:$0xff]  }
 0x299   : > { %v1024_v45 = vpop.xlane.xlu0 %1023 }
 0x29a   : > { %2538 = vpow2.f32 %v1065_v43  ;;  %v1051_v46 = vsub.f32 %v969_v8, %v1024_v45  ;;  %v2523_v43 = vld [vmem:[#allocation2 + $0x28] sm:$0xff]  }
 0x29b   : > { %v1026_v47 = vpop.xlane.xlu1 %1025  ;;  %2540 = vpow2.f32 %v1069_v44  ;;  %2336 = vmatpush3.bf16.msra.mxu0 %v2519_v39  ;;  %v2524_v44 = vld [vmem:[#allocation2 + $0x30] sm:$0xff]  }
 0x29c   : > { %v1071_v48 = vmul.f32 1.442695, %v1051_v46  ;;  %v1052_v49 = vsub.f32 %v3008_v11, %v1026_v47  ;;  %2337 = vmatprep.subr.bf16.mxu0 %v2520_v40 }
 0x29d   : > { %v1028_v50 = vpop.xlane.xlu0 %1027 }
 0x29e   : > { %2542 = vpow2.f32 %v1071_v48  ;;  %v1073_v51 = vmul.f32 1.442695, %v1052_v49  ;;  %v1053_v52 = vsub.f32 %v3010_v12, %v1028_v50 }
 0x29f   : > { %v1030_v53 = vpop.xlane.xlu1 %1029  ;;  %2338 = vmatpush3.bf16.msra.mxu0 %v2520_v40 }
 0x2a0   : > { %v3055_v54 = vpop.eup %2534  ;;  %v1075_v55 = vmul.f32 1.442695, %v1053_v52  ;;  %v1054_v56 = vsub.f32 %v3013_v13, %v1030_v53  ;;  %2544 = vpow2.f32 %v1073_v51  ;;  %2339 = vmatprep.subr.bf16.mxu0 %v2521_v41 }
 0x2a1   : > { %1095 = vadd.xlane.f32.xlu0 %v3055_v54  ;;  %v1032_v57 = vpop.xlane.xlu0 %1031  ;;  %v3060_v60 = vpop.eup %2536 }
 0x2a2   : > { %2546 = vpow2.f32 %v1075_v55  ;;  %v1077_v58 = vmul.f32 1.442695, %v1054_v56  ;;  %v1055_v59 = vsub.f32 %v3016_v16, %v1032_v57 }
 0x2a3   : > { %v1034_v61 = vpop.xlane.xlu1 %1033  ;;  %2340 = vmatpush3.bf16.msra.mxu0 %v2521_v41 }
 0x2a4   : > { %v3062_v62 = vpop.eup %2538  ;;  %v1079_v63 = vmul.f32 1.442695, %v1055_v59  ;;  %v1056_v0 = vsub.f32 %v3019_v19, %v1034_v61  ;;  %2548 = vpow2.f32 %v1077_v58  ;;  %2341 = vmatprep.subr.bf16.mxu0 %v2522_v42 }
 0x2a5   : > { %1099 = vadd.xlane.f32.xlu0 %v3060_v60  ;;  %1097 = vadd.xlane.f32.xlu1 %v3062_v62  ;;  %v1036_v1 = vpop.xlane.xlu0 %1035  ;;  %v3068_v4 = vpop.eup %2540 }
 0x2a6   : > { %2550 = vpow2.f32 %v1079_v63  ;;  %v1081_v2 = vmul.f32 1.442695, %v1056_v0  ;;  %v1057_v3 = vsub.f32 %v3022_v20, %v1036_v1 }
 0x2a7   : > { %v1038_v5 = vpop.xlane.xlu1 %1037  ;;  %2342 = vmatpush3.bf16.msra.mxu0 %v2522_v42 }
 0x2a8   : > { %v3070_v6 = vpop.eup %2542  ;;  %v1083_v7 = vmul.f32 1.442695, %v1057_v3  ;;  %v1058_v8 = vsub.f32 %v3025_v21, %v1038_v5  ;;  %2552 = vpow2.f32 %v1081_v2  ;;  %2343 = vmatprep.subr.bf16.mxu0 %v2523_v43 }
 0x2a9   : > { %1101 = vadd.xlane.f32.xlu1 %v3068_v4  ;;  %1103 = vadd.xlane.f32.xlu0 %v3070_v6  ;;  %v1040_v9 = vpop.xlane.xlu0 %1039 }
 0x2aa   : > { %2554 = vpow2.f32 %v1083_v7  ;;  %v1085_v10 = vmul.f32 1.442695, %v1058_v8  ;;  %v1059_v11 = vsub.f32 %v3028_v24, %v1040_v9  ;;  %v3076_v12 = vpop.eup %2544 }
 0x2ab   : > { %v1042_v13 = vpop.xlane.xlu1 %1041  ;;  %2344 = vmatpush3.bf16.msra.mxu0 %v2523_v43 }
 0x2ac   : > { %v3078_v14 = vpop.eup %2546  ;;  %v1087_v15 = vmul.f32 1.442695, %v1059_v11  ;;  %v1060_v16 = vsub.f32 %v3031_v27, %v1042_v13  ;;  %2556 = vpow2.f32 %v1085_v10  ;;  %2345 = vmatprep.subr.bf16.mxu0 %v2524_v44 }
 0x2ad   : > { %1105 = vadd.xlane.f32.xlu1 %v3076_v12  ;;  %1107 = vadd.xlane.f32.xlu0 %v3078_v14  ;;  %v1044_v17 = vpop.xlane.xlu0 %1043 }
 0x2ae   : > { %2558 = vpow2.f32 %v1087_v15  ;;  %v1089_v18 = vmul.f32 1.442695, %v1060_v16  ;;  %v1061_v19 = vsub.f32 %v3034_v28, %v1044_v17  ;;  %v3084_v20 = vpop.eup %2548 }
 0x2af   : > { %v1046_v21 = vpop.xlane.xlu1 %1045  ;;  %2346 = vmatpush3.bf16.msra.mxu0 %v2524_v44 }
 0x2b0   : > { %v3087_v23 = vpop.eup %2550  ;;  %v1091_v24 = vmul.f32 1.442695, %v1061_v19  ;;  %v1062_v25 = vsub.f32 %v3037_v29, %v1046_v21  ;;  %2560 = vpow2.f32 %v1089_v18  ;;  %v2514_v29 = vld [vmem:[%s3046_s30 + $0x20] sm:$0xff]  }
 0x2b1   : > { %1109 = vadd.xlane.f32.xlu1 %v3084_v20  ;;  %1111 = vadd.xlane.f32.xlu0 %v3087_v23 }
 0x2b2   : > { %2562 = vpow2.f32 %v1091_v24  ;;  %v1093_v26 = vmul.f32 1.442695, %v1062_v25  ;;  %v3092_v27 = vpop.eup %2552  ;;  %2309 = vmatprep.subr.bf16.mxu1 %v2514_v29 }
 0x2b3   : > { %2310 = vmatpush3.bf16.msra.mxu1 %v2514_v29 }
 0x2b4   : > { %v3094_v28 = vpop.eup %2554  ;;  %2564 = vpow2.f32 %v1093_v26  ;;  %2311 = vmatprep.subr.bf16.mxu1 %v2515_v32 }
 0x2b5   : > { %1113 = vadd.xlane.f32.xlu1 %v3092_v27  ;;  %1115 = vadd.xlane.f32.xlu0 %v3094_v28 }
 0x2b6   : > { %v3099_v30 = vpop.eup %2556 }
 0x2b7   : > { %2312 = vmatpush3.bf16.msra.mxu1 %v2515_v32 }
 0x2b8   : > { %v3101_v31 = vpop.eup %2558  ;;  %2313 = vmatprep.subr.bf16.mxu1 %v2516_v35 }
 0x2b9   : > { %1117 = vadd.xlane.f32.xlu1 %v3099_v30  ;;  %1119 = vadd.xlane.f32.xlu0 %v3101_v31 }
 0x2ba   : > { %v3106_v33 = vpop.eup %2560 }
 0x2bb   : > { %2314 = vmatpush3.bf16.msra.mxu1 %v2516_v35 }
 0x2bc   : > { %v3108_v34 = vpop.eup %2562  ;;  %2315 = vmatprep.subr.bf16.mxu1 %v2517_v37 }
 0x2bd   : > { %1121 = vadd.xlane.f32.xlu1 %v3106_v33  ;;  %1123 = vadd.xlane.f32.xlu0 %v3108_v34 }
 0x2be   : > { %v3113_v36 = vpop.eup %2564 }
 0x2bf   : > { %2316 = vmatpush3.bf16.msra.mxu1 %v2517_v37 }
 0x2c1   : > { %1125 = vadd.xlane.f32.xlu1 %v3113_v36 }
 0x32e   : > { %v1096_v45 = vpop.xlane.xlu0 %1095 }
 0x32f   : > { %2566 = vrcp.f32 %v1096_v45 }
 0x332   : > { %v1098_v46 = vpop.xlane.xlu1 %1097  ;;  %v1100_v47 = vpop.xlane.xlu0 %1099 }
 0x333   : > { %2568 = vrcp.f32 %v1098_v46 }
 0x334   : > { %2570 = vrcp.f32 %v1100_v47 }
 0x336   : > { %v1102_v48 = vpop.xlane.xlu1 %1101  ;;  %v1104_v49 = vpop.xlane.xlu0 %1103 }
 0x337   : > { %2572 = vrcp.f32 %v1102_v48 }
 0x338   : > { %2574 = vrcp.f32 %v1104_v49 }
 0x339   : > { %v2567_v52 = vpop.eup %2566 }
 0x33a   : > { %v1106_v50 = vpop.xlane.xlu1 %1105  ;;  %v1108_v51 = vpop.xlane.xlu0 %1107  ;;  %v1143_v57 = vmul.f32 %v2567_v52, %v3055_v54 }
 0x33b   : > { %2576 = vrcp.f32 %v1106_v50 }
 0x33c   : > { %2578 = vrcp.f32 %v1108_v51 }
 0x33d   : > { %v2569_v53 = vpop.eup %2568 }
 0x33e   : > { %v1110_v55 = vpop.xlane.xlu1 %1109  ;;  %v1112_v56 = vpop.xlane.xlu0 %1111  ;;  %v1144_v58 = vmul.f32 %v2569_v53, %v3062_v62 }
 0x33f   : > { %v2571_v59 = vpop.eup %2570  ;;  %2580 = vrcp.f32 %v1110_v55 }
 0x340   : > { %v1159_v61 = vpack.c.bf16 %v1144_v58, %v1143_v57  ;;  %2582 = vrcp.f32 %v1112_v56  ;;  %v1145_v0 = vmul.f32 %v2571_v59, %v3060_v60 }
 0x341   : > { %v2573_v63 = vpop.eup %2572 }
 0x342   : > { %v1146_v1 = vmul.f32 %v2573_v63, %v3068_v4  ;;  %v1114_v2 = vpop.xlane.xlu1 %1113  ;;  %2317 = vmatprep.mubr.bf16.mxu1 %v1159_v61  ;;  %v1116_v3 = vpop.xlane.xlu0 %1115 }
 0x343   : > { %v2575_v5 = vpop.eup %2574  ;;  %2584 = vrcp.f32 %v1114_v2  ;;  %v2527_v2 = vld [vmem:[#allocation4 + $0x8] sm:$0xff]  }
 0x344   : > { %v1160_v7 = vpack.c.bf16 %v1146_v1, %v1145_v0  ;;  %2586 = vrcp.f32 %v1116_v3  ;;  %v1147_v9 = vmul.f32 %v2575_v5, %v3070_v6  ;;  %v2526_v1 = vld [vmem:[#allocation4] sm:$0xff]   ;;  %v2528_v3 = vld [vmem:[#allocation4 + $0x10] sm:$0xff]   ;;  %v2529_v5 = vld [vmem:[#allocation4 + $0x18] sm:$0xff]  }
 0x345   : > { %v2577_v8 = vpop.eup %2576  ;;  %2365 = vmatprep.subr.bf16.mxu1 %v2526_v1 }
 0x346   : > { %v1118_v54 = vpop.xlane.xlu1 %1117  ;;  %2318 = vmatmul.mubr.bf16.vlgmr.msra.gmra.mrb[16].mxu1 %v1160_v7  ;;  %v1120_v62 = vpop.xlane.xlu0 %1119  ;;  %v1148_v10 = vmul.f32 %v2577_v8, %v3076_v12  ;;  %v2530_v7 = vld [vmem:[#allocation4 + $0x20] sm:$0xff]   ;;  %v2531_v8 = vld [vmem:[#allocation4 + $0x28] sm:$0xff]  }
 0x347   : > { %v2579_v11 = vpop.eup %2578  ;;  %2588 = vrcp.f32 %v1118_v54  ;;  %2366 = vmatpush3.bf16.msra.mxu1 %v2526_v1  ;;  %v2532_v54 = vld [vmem:[#allocation4 + $0x30] sm:$0xff]  }
 0x348   : > { %v1161_v60 = vpack.c.bf16 %v1148_v10, %v1147_v9  ;;  %2590 = vrcp.f32 %v1120_v62  ;;  %v1149_v16 = vmul.f32 %v2579_v11, %v3078_v14  ;;  %2367 = vmatprep.subr.bf16.mxu1 %v2527_v2  ;;  %v2533_v62 = vld [vmem:[#allocation4 + $0x38] sm:$0xff]   ;;  %v3137_v9 = vld [vmem:[%s500_s13] ss:$0 sm:$0xff] }
 0x349   : > { %v2581_v13 = vpop.eup %2580 }
 0x34a   : > { %v1122_v4 = vpop.xlane.xlu1 %1121  ;;  %2321 = vmatprep.mubr.bf16.mxu1 %v1161_v60  ;;  %v1124_v15 = vpop.xlane.xlu0 %1123  ;;  %v1150_v17 = vmul.f32 %v2581_v13, %v3084_v20 }
 0x34b   : > { %v2583_v18 = vpop.eup %2582  ;;  %2592 = vrcp.f32 %v1122_v4  ;;  %2368 = vmatpush3.bf16.msra.mxu1 %v2527_v2 }
 0x34c   : > { %v1162_v19 = vpack.c.bf16 %v1150_v17, %v1149_v16  ;;  %2594 = vrcp.f32 %v1124_v15  ;;  %v1151_v12 = vmul.f32 %v2583_v18, %v3087_v23  ;;  %2369 = vmatprep.subr.bf16.mxu1 %v2528_v3 }
 0x34d   : > { %v2585_v21 = vpop.eup %2584 }
 0x34e   : > { %v1126_v6 = vpop.xlane.xlu1 %1125  ;;  %2322 = vmatmul.mubr.bf16.gmra.mrb[20].mxu1 %v1162_v19  ;;  %v1152_v22 = vmul.f32 %v2585_v21, %v3092_v27  ;;  %v2587_v24 = vpop.eup %2586 }
 0x34f   : > { %2596 = vrcp.f32 %v1126_v6  ;;  %v1153_v14 = vmul.f32 %v2587_v24, %v3094_v28  ;;  %v2525_v28 = vld [vmem:[#allocation2 + $0x38] sm:$0xff]   ;;  %2370 = vmatpush3.bf16.msra.mxu1 %v2528_v3 }
 0x350   : > { %v1163_v25 = vpack.c.bf16 %v1152_v22, %v1151_v12  ;;  %2347 = vmatprep.subr.bf16.mxu0 %v2525_v28  ;;  %2371 = vmatprep.subr.bf16.mxu1 %v2529_v5 }
 0x351   : > { %v2589_v26 = vpop.eup %2588  ;;  %2348 = vmatpush3.bf16.msra.mxu0 %v2525_v28 }
 0x352   : > { %2325 = vmatprep.mubr.bf16.mxu1 %v1163_v25  ;;  %v1154_v20 = vmul.f32 %v2589_v26, %v3099_v30  ;;  %v2591_v29 = vpop.eup %2590 }
 0x353   : > { %v1155_v37 = vmul.f32 %v2591_v29, %v3101_v31  ;;  %2372 = vmatpush3.bf16.msra.mxu1 %v2529_v5 }
 0x354   : > { %v1164_v32 = vpack.c.bf16 %v1154_v20, %v1153_v14  ;;  %2373 = vmatprep.subr.bf16.mxu1 %v2530_v7 }
 0x355   : > { %v2593_v35 = vpop.eup %2592 }
 0x356   : > { %2326 = vmatmul.mubr.bf16.gmra.mrb[24].mxu1 %v1164_v32  ;;  %v1156_v38 = vmul.f32 %v2593_v35, %v3106_v33  ;;  %v2595_v23 = vpop.eup %2594 }
 0x357   : > { %v1157_v40 = vmul.f32 %v2595_v23, %v3108_v34  ;;  %2374 = vmatpush3.bf16.msra.mxu1 %v2530_v7 }
 0x358   : > { %v1165_v39 = vpack.c.bf16 %v1156_v38, %v1155_v37  ;;  %2375 = vmatprep.subr.bf16.mxu1 %v2531_v8 }
 0x359   : > { %v2597_v27 = vpop.eup %2596 }
 0x35a   : > { %2329 = vmatprep.mubr.bf16.mxu1 %v1165_v39  ;;  %v1158_v41 = vmul.f32 %v2597_v27, %v3113_v36 }
 0x35b   : > { %2376 = vmatpush3.bf16.msra.mxu1 %v2531_v8 }
 0x35c   : > { %v1166_v42 = vpack.c.bf16 %v1158_v41, %v1157_v40  ;;  %2377 = vmatprep.subr.bf16.mxu1 %v2532_v54 }
 0x35e   : > { %2330 = vmatmul.mubr.bf16.gmra.mrb[28].mxu1 %v1166_v42 }
 0x35f   : > { %2378 = vmatpush3.bf16.msra.mxu1 %v2532_v54 }
 0x360   : > { %2379 = vmatprep.subr.bf16.mxu1 %v2533_v62 }
 0x363   : > { %2380 = vmatpush3.bf16.msra.mxu1 %v2533_v62 }
 0x419   : > { %v2319_v30 = vpop.f32.mrb[16].mxu1 }
 0x41a   : > { %v1249_v43 = vpop.f32.mrb[17].mxu1 }
 0x41b   : > { %v2320_v44 = vpop.f32.mrb[18].mxu1 }
 0x41c   : > { %v1313_v45 = vpack.c.bf16 %v2320_v44, %v2319_v30  ;;  %v1252_v31 = vpop.f32.mrb[19].mxu1 }
 0x41d   : > { %v1312_v46 = vpack.c.bf16 %v1252_v31, %v1249_v43 }
 0x41f   : > { %2349 = vmatprep.mubr.bf16.mxu0 %v1312_v46 }
 0x420   : > { %2350 = vmatmul.mubr.bf16.vlgmr.msra.gmra.mrb[0].mxu0 %v1313_v45 }
 0x421   : > { %v2323_v33 = vpop.f32.mrb[20].mxu1 }
 0x422   : > { %v1265_v47 = vpop.f32.mrb[21].mxu1 }
 0x423   : > { %v2324_v48 = vpop.f32.mrb[22].mxu1 }
 0x424   : > { %v1315_v49 = vpack.c.bf16 %v2324_v48, %v2323_v33  ;;  %v1268_v34 = vpop.f32.mrb[23].mxu1 }
 0x425   : > { %v1314_v50 = vpack.c.bf16 %v1268_v34, %v1265_v47 }
 0x427   : > { %2353 = vmatprep.mubr.bf16.mxu0 %v1314_v50 }
 0x428   : > { %2354 = vmatmul.mubr.bf16.gmra.mrb[4].mxu0 %v1315_v49 }
 0x429   : > { %v2327_v36 = vpop.f32.mrb[24].mxu1 }
 0x42a   : > { %v1281_v51 = vpop.f32.mrb[25].mxu1 }
 0x42b   : > { %v2328_v52 = vpop.f32.mrb[26].mxu1 }
 0x42c   : > { %v1317_v53 = vpack.c.bf16 %v2328_v52, %v2327_v36  ;;  %v1284_v55 = vpop.f32.mrb[27].mxu1 }
 0x42d   : > { %v1316_v56 = vpack.c.bf16 %v1284_v55, %v1281_v51 }
 0x42f   : > { %2357 = vmatprep.mubr.bf16.mxu0 %v1316_v56 }
 0x430   : > { %2358 = vmatmul.mubr.bf16.gmra.mrb[8].mxu0 %v1317_v53 }
 0x431   : > { %v2331_v57 = vpop.f32.mrb[28].mxu1 }
 0x432   : > { %v1297_v58 = vpop.f32.mrb[29].mxu1 }
 0x433   : > { %v2332_v59 = vpop.f32.mrb[30].mxu1 }
 0x434   : > { %v1319_v61 = vpack.c.bf16 %v2332_v59, %v2331_v57  ;;  %v1300_v63 = vpop.f32.mrb[31].mxu1 }
 0x435   : > { %v1318_v0 = vpack.c.bf16 %v1300_v63, %v1297_v58 }
 0x437   : > { %2361 = vmatprep.mubr.bf16.mxu0 %v1318_v0 }
 0x438   : > { %2362 = vmatmul.mubr.bf16.gmra.mrb[12].mxu0 %v1319_v61 }
 0x4f3   : > { %v2351_v10 = vpop.f32.mrb[0].mxu0 }
 0x4f4   : > { %v3140_v11 = vadd.f32 %v2351_v10, %v3137_v9  ;;  %v1418_v60 = vpop.f32.mrb[1].mxu0 }
 0x4f5   : > { %v3143_v13 = vadd.f32 %v3137_v9, %v1418_v60  ;;  %v2352_v4 = vpop.f32.mrb[2].mxu0 }
 0x4f6   : > { %v2092_v15 = vmul.f32 -1.442695, %v3140_v11  ;;  %v3147_v16 = vadd.f32 %v2352_v4, %v3137_v9  ;;  %v1421_v17 = vpop.f32.mrb[3].mxu0 }
 0x4f7   : > { %v2090_v18 = vmul.f32 -1.442695, %v3143_v13  ;;  %v3151_v19 = vadd.f32 %v3137_v9, %v1421_v17 }
 0x4f8   : > { %2598 = vpow2.f32 %v2092_v15  ;;  %v2093_v21 = vmul.f32 -1.442695, %v3147_v16 }
 0x4f9   : > { %2600 = vpow2.f32 %v2090_v18  ;;  %v2091_v6 = vmul.f32 -1.442695, %v3151_v19 }
 0x4fa   : > { %2602 = vpow2.f32 %v2093_v21 }
 0x4fb   : > { %2604 = vpow2.f32 %v2091_v6  ;;  %v2355_v12 = vpop.f32.mrb[4].mxu0 }
 0x4fc   : > { %v3156_v22 = vadd.f32 %v2355_v12, %v3137_v9  ;;  %v1434_v24 = vpop.f32.mrb[5].mxu0 }
 0x4fd   : > { %v3159_v25 = vadd.f32 %v3137_v9, %v1434_v24  ;;  %v2356_v26 = vpop.f32.mrb[6].mxu0 }
 0x4fe   : > { %v2096_v14 = vmul.f32 -1.442695, %v3156_v22  ;;  %v3163_v20 = vadd.f32 %v2356_v26, %v3137_v9  ;;  %v1437_v29 = vpop.f32.mrb[7].mxu0 }
 0x4ff   : > { %v2094_v32 = vmul.f32 -1.442695, %v3159_v25  ;;  %v3167_v35 = vadd.f32 %v3137_v9, %v1437_v29 }
 0x500   : > { %2606 = vpow2.f32 %v2096_v14  ;;  %v2097_v37 = vmul.f32 -1.442695, %v3163_v20 }
 0x501   : > { %2608 = vpow2.f32 %v2094_v32  ;;  %v2095_v38 = vmul.f32 -1.442695, %v3167_v35 }
 0x502   : > { %v2599_v23 = vpop.eup %2598  ;;  %2610 = vpow2.f32 %v2097_v37 }
 0x503   : > { %v2601_v39 = vpop.eup %2600  ;;  %v1547_v27 = vadd.f32 1.0, %v2599_v23  ;;  %2612 = vpow2.f32 %v2095_v38  ;;  %v2359_v40 = vpop.f32.mrb[8].mxu0 }
 0x504   : > { %v2603_v41 = vpop.eup %2602  ;;  %v1545_v42 = vadd.f32 1.0, %v2601_v39  ;;  %v3172_v28 = vadd.f32 %v2359_v40, %v3137_v9  ;;  %v1450_v30 = vpop.f32.mrb[9].mxu0 }
 0x505   : > { %v2605_v43 = vpop.eup %2604  ;;  %2614 = vrcp.f32 %v1547_v27  ;;  %v1548_v44 = vadd.f32 1.0, %v2603_v41  ;;  %v3175_v45 = vadd.f32 %v3137_v9, %v1450_v30  ;;  %v2360_v31 = vpop.f32.mrb[10].mxu0 }
 0x506   : > { %2616 = vrcp.f32 %v1545_v42  ;;  %v1546_v46 = vadd.f32 1.0, %v2605_v43  ;;  %v2100_v33 = vmul.f32 -1.442695, %v3172_v28  ;;  %v3179_v47 = vadd.f32 %v2360_v31, %v3137_v9  ;;  %v1453_v48 = vpop.f32.mrb[11].mxu0 }
 0x507   : > { %2618 = vrcp.f32 %v1548_v44  ;;  %v2098_v49 = vmul.f32 -1.442695, %v3175_v45  ;;  %v3183_v34 = vadd.f32 %v3137_v9, %v1453_v48 }
 0x508   : > { %2620 = vrcp.f32 %v1546_v46  ;;  %v2101_v50 = vmul.f32 -1.442695, %v3179_v47 }
 0x509   : > { %2622 = vpow2.f32 %v2100_v33  ;;  %v2099_v36 = vmul.f32 -1.442695, %v3183_v34 }
 0x50a   : > { %v2607_v51 = vpop.eup %2606  ;;  %2624 = vpow2.f32 %v2098_v49 }
 0x50b   : > { %v2609_v52 = vpop.eup %2608  ;;  %v1551_v53 = vadd.f32 1.0, %v2607_v51  ;;  %2626 = vpow2.f32 %v2101_v50  ;;  %v2363_v55 = vpop.f32.mrb[12].mxu0 }
 0x50c   : > { %v2611_v56 = vpop.eup %2610  ;;  %v1549_v57 = vadd.f32 1.0, %v2609_v52  ;;  %2628 = vpow2.f32 %v2099_v36  ;;  %v3188_v58 = vadd.f32 %v2363_v55, %v3137_v9  ;;  %v1466_v59 = vpop.f32.mrb[13].mxu0 }
 0x50d   : > { %v2613_v61 = vpop.eup %2612  ;;  %2630 = vrcp.f32 %v1551_v53  ;;  %v1552_v63 = vadd.f32 1.0, %v2611_v56  ;;  %v3191_v0 = vadd.f32 %v3137_v9, %v1466_v59  ;;  %v2364_v1 = vpop.f32.mrb[14].mxu0 }
 0x50e   : > { %2632 = vrcp.f32 %v1549_v57  ;;  %v1550_v2 = vadd.f32 1.0, %v2613_v61  ;;  %v2104_v3 = vmul.f32 -1.442695, %v3188_v58  ;;  %v3195_v5 = vadd.f32 %v2364_v1, %v3137_v9  ;;  %v1469_v7 = vpop.f32.mrb[15].mxu0 }
 0x50f   : > { %v2615_v8 = vpop.eup %2614  ;;  %2634 = vrcp.f32 %v1552_v63  ;;  %v2102_v54 = vmul.f32 -1.442695, %v3191_v0  ;;  %v3199_v62 = vadd.f32 %v3137_v9, %v1469_v7 }
 0x510   : > { %v2617_v10 = vpop.eup %2616  ;;  %2636 = vrcp.f32 %v1550_v2  ;;  %v2105_v60 = vmul.f32 -1.442695, %v3195_v5  ;;  %v1595_v18 = vmul.f32 %v2615_v8, %v3140_v11 }
 0x511   : > { %v2619_v4 = vpop.eup %2618  ;;  %2638 = vpow2.f32 %v2104_v3  ;;  %v2103_v15 = vmul.f32 -1.442695, %v3199_v62  ;;  %v1593_v12 = vmul.f32 %v2617_v10, %v3143_v13 }
 0x512   : > { %v2621_v17 = vpop.eup %2620  ;;  %v1596_v21 = vmul.f32 %v2619_v4, %v3147_v16  ;;  %2640 = vpow2.f32 %v2102_v54 }
 0x513   : > { %v2623_v6 = vpop.eup %2622  ;;  %v1594_v9 = vmul.f32 %v2621_v17, %v3151_v19  ;;  %2642 = vpow2.f32 %v2105_v60 }
 0x514   : > { %v2625_v24 = vpop.eup %2624  ;;  %v1610_v26 = vpack.c.bf16 %v1596_v21, %v1595_v18  ;;  %v1555_v14 = vadd.f32 1.0, %v2623_v6  ;;  %2644 = vpow2.f32 %v2103_v15 }
 0x515   : > { %v2627_v29 = vpop.eup %2626  ;;  %v1553_v32 = vadd.f32 1.0, %v2625_v24  ;;  %v1609_v37 = vpack.c.bf16 %v1594_v9, %v1593_v12 }
 0x516   : > { %v2629_v38 = vpop.eup %2628  ;;  %2646 = vrcp.f32 %v1555_v14  ;;  %v1556_v23 = vadd.f32 1.0, %v2627_v29 }
 0x517   : > { %v2631_v11 = vpop.eup %2630  ;;  %2648 = vrcp.f32 %v1553_v32  ;;  %v1554_v16 = vadd.f32 1.0, %v2629_v38  ;;  %2381 = vmatprep.mubr.bf16.mxu1 %v1609_v37 }
 0x518   : > { %v2633_v39 = vpop.eup %2632  ;;  %2650 = vrcp.f32 %v1556_v23  ;;  %2382 = vmatmul.mubr.bf16.vlgmr.msra.gmra.mrb[32].mxu1 %v1610_v26  ;;  %v1599_v27 = vmul.f32 %v2631_v11, %v3156_v22 }
 0x519   : > { %v2635_v13 = vpop.eup %2634  ;;  %2652 = vrcp.f32 %v1554_v16  ;;  %v1597_v42 = vmul.f32 %v2633_v39, %v3159_v25 }
 0x51a   : > { %v2637_v19 = vpop.eup %2636  ;;  %v1600_v40 = vmul.f32 %v2635_v13, %v3163_v20 }
 0x51b   : > { %v2639_v41 = vpop.eup %2638  ;;  %v1598_v30 = vmul.f32 %v2637_v19, %v3167_v35 }
 0x51c   : > { %v2641_v43 = vpop.eup %2640  ;;  %v1559_v44 = vadd.f32 1.0, %v2639_v41  ;;  %v1612_v31 = vpack.c.bf16 %v1600_v40, %v1599_v27 }
 0x51d   : > { %v2643_v46 = vpop.eup %2642  ;;  %v1557_v33 = vadd.f32 1.0, %v2641_v43  ;;  %v1611_v48 = vpack.c.bf16 %v1598_v30, %v1597_v42 }
 0x51e   : > { %v2645_v49 = vpop.eup %2644  ;;  %2654 = vrcp.f32 %v1559_v44  ;;  %v1560_v50 = vadd.f32 1.0, %v2643_v46 }
 0x51f   : > { %2656 = vrcp.f32 %v1557_v33  ;;  %v1558_v36 = vadd.f32 1.0, %v2645_v49  ;;  %2385 = vmatprep.mubr.bf16.mxu1 %v1611_v48 }
 0x520   : > { %v2647_v22 = vpop.eup %2646  ;;  %2658 = vrcp.f32 %v1560_v50  ;;  %2386 = vmatmul.mubr.bf16.gmra.mrb[36].mxu1 %v1612_v31 }
 0x521   : > { %v2649_v20 = vpop.eup %2648  ;;  %2660 = vrcp.f32 %v1558_v36  ;;  %v1603_v35 = vmul.f32 %v2647_v22, %v3172_v28 }
 0x522   : > { %v2651_v25 = vpop.eup %2650  ;;  %v1601_v53 = vmul.f32 %v2649_v20, %v3175_v45 }
 0x523   : > { %v2653_v51 = vpop.eup %2652  ;;  %v1604_v52 = vmul.f32 %v2651_v25, %v3179_v47 }
 0x524   : > { %v1602_v55 = vmul.f32 %v2653_v51, %v3183_v34  ;;  %v2106_v34 = vld [vmem:[%s3286_s10] ss:$0 sm:$0xff] }
 0x525   : > { %v1614_v56 = vpack.c.bf16 %v1604_v52, %v1603_v35 }
 0x526   : > { %v1613_v57 = vpack.c.bf16 %v1602_v55, %v1601_v53 }
 0x528   : > { %v2655_v59 = vpop.eup %2654  ;;  %2389 = vmatprep.mubr.bf16.mxu1 %v1613_v57 }
 0x529   : > { %v2657_v61 = vpop.eup %2656  ;;  %2390 = vmatmul.mubr.bf16.gmra.mrb[40].mxu1 %v1614_v56  ;;  %v1607_v2 = vmul.f32 %v2655_v59, %v3188_v58 }
 0x52a   : > { %v2659_v63 = vpop.eup %2658  ;;  %v1605_v28 = vmul.f32 %v2657_v61, %v3191_v0 }
 0x52b   : > { %v2661_v1 = vpop.eup %2660  ;;  %v1608_v3 = vmul.f32 %v2659_v63, %v3195_v5 }
 0x52c   : > { %v1606_v47 = vmul.f32 %v2661_v1, %v3199_v62 }
 0x52d   : > { %v1616_v45 = vpack.c.bf16 %v1608_v3, %v1607_v2 }
 0x52e   : > { %v1615_v7 = vpack.c.bf16 %v1606_v47, %v1605_v28 }
 0x530   : > { %2393 = vmatprep.mubr.bf16.mxu1 %v1615_v7 }
 0x531   : > { %2394 = vmatmul.mubr.bf16.gmra.mrb[44].mxu1 %v1616_v45 }
 0x5eb   : > { %v2383_v8 = vpop.f32.mrb[32].mxu1 }
 0x5ec   : > { %v1731_v54 = vadd.f32 %v2383_v8, %v2106_v34  ;;  %v1722_v10 = vpop.f32.mrb[33].mxu1 }
 0x5ed   : > { %v1723_v58 = vadd.f32 %v2106_v34, %v1722_v10  ;;  %v2384_v0 = vpop.f32.mrb[34].mxu1 }
 0x5ee   : > { %v2137_v5 = vpack.c.bf16 %v1731_v54, %v1731_v54  ;;  %v1734_v62 = vadd.f32 %v2384_v0, %v2106_v34  ;;  %v1725_v60 = vpop.f32.mrb[35].mxu1 }
 0x5ef   : > { %v2135_v4 = vpack.c.bf16 %v1723_v58, %v1723_v58  ;;  %v1726_v15 = vadd.f32 %v2106_v34, %v1725_v60 }
 0x5f0   : > { %1852 = vst.msk [vmem:[%s3227_s22 + $0x8] sm:$0xf] %vm1849_vm2, %v2137_v5  ;;  %v2138_v17 = vpack.c.bf16 %v1734_v62, %v1734_v62 }
 0x5f1   : > { %1850 = vst.msk [vmem:[%s3227_s22] sm:$0xf] %vm1849_vm2, %v2135_v4  ;;  %v2136_v18 = vpack.c.bf16 %v1726_v15, %v1726_v15 }
 0x5f2   : > { %1853 = vst.msk [vmem:[%s3227_s22 + $0xc] sm:$0xf] %vm1849_vm2, %v2138_v17 }
 0x5f3   : > { %1851 = vst.msk [vmem:[%s3227_s22 + $0x4] sm:$0xf] %vm1849_vm2, %v2136_v18  ;;  %v2387_v21 = vpop.f32.mrb[36].mxu1 }
 0x5f4   : > { %v1747_v6 = vadd.f32 %v2387_v21, %v2106_v34  ;;  %v1738_v12 = vpop.f32.mrb[37].mxu1 }
 0x5f5   : > { %v1739_v9 = vadd.f32 %v2106_v34, %v1738_v12  ;;  %v2388_v24 = vpop.f32.mrb[38].mxu1 }
 0x5f6   : > { %v2141_v26 = vpack.c.bf16 %v1747_v6, %v1747_v6  ;;  %v1750_v14 = vadd.f32 %v2388_v24, %v2106_v34  ;;  %v1741_v29 = vpop.f32.mrb[39].mxu1 }
 0x5f7   : > { %v2139_v32 = vpack.c.bf16 %v1739_v9, %v1739_v9  ;;  %v1742_v37 = vadd.f32 %v2106_v34, %v1741_v29 }
 0x5f8   : > { %1856 = vst.msk [vmem:[%s3227_s22 + $0x18] sm:$0xf] %vm1849_vm2, %v2141_v26  ;;  %v2142_v38 = vpack.c.bf16 %v1750_v14, %v1750_v14 }
 0x5f9   : > { %1854 = vst.msk [vmem:[%s3227_s22 + $0x10] sm:$0xf] %vm1849_vm2, %v2139_v32  ;;  %v2140_v23 = vpack.c.bf16 %v1742_v37, %v1742_v37 }
 0x5fa   : > { %1857 = vst.msk [vmem:[%s3227_s22 + $0x1c] sm:$0xf] %vm1849_vm2, %v2142_v38 }
 0x5fb   : > { %1855 = vst.msk [vmem:[%s3227_s22 + $0x14] sm:$0xf] %vm1849_vm2, %v2140_v23 }
 0x5fc   : > { %v2391_v11 = vpop.f32.mrb[40].mxu1 }
 0x5fd   : > { %v1763_v16 = vadd.f32 %v2391_v11, %v2106_v34  ;;  %v1754_v39 = vpop.f32.mrb[41].mxu1 }
 0x5fe   : > { %v1755_v13 = vadd.f32 %v2106_v34, %v1754_v39  ;;  %v2392_v19 = vpop.f32.mrb[42].mxu1 }
 0x5ff   : > { %v2145_v27 = vpack.c.bf16 %v1763_v16, %v1763_v16  ;;  %v1766_v40 = vadd.f32 %v2392_v19, %v2106_v34  ;;  %v1757_v41 = vpop.f32.mrb[43].mxu1 }
 0x600   : > { %v2143_v42 = vpack.c.bf16 %v1755_v13, %v1755_v13  ;;  %v1758_v30 = vadd.f32 %v2106_v34, %v1757_v41 }
 0x601   : > { %1860 = vst.msk [vmem:[%s3227_s22 + $0x28] sm:$0xf] %vm1849_vm2, %v2145_v27  ;;  %v2146_v43 = vpack.c.bf16 %v1766_v40, %v1766_v40 }
 0x602   : > { %1858 = vst.msk [vmem:[%s3227_s22 + $0x20] sm:$0xf] %vm1849_vm2, %v2143_v42  ;;  %v2144_v44 = vpack.c.bf16 %v1758_v30, %v1758_v30 }
 0x603   : > { %1861 = vst.msk [vmem:[%s3227_s22 + $0x2c] sm:$0xf] %vm1849_vm2, %v2146_v43 }
 0x604   : > { %1859 = vst.msk [vmem:[%s3227_s22 + $0x24] sm:$0xf] %vm1849_vm2, %v2144_v44  ;;  %v2395_v31 = vpop.f32.mrb[44].mxu1 }
 0x605   : > { %v1779_v46 = vadd.f32 %v2395_v31, %v2106_v34  ;;  %v1770_v33 = vpop.f32.mrb[45].mxu1 }
 0x606   : > { %v1771_v48 = vadd.f32 %v2106_v34, %v1770_v33  ;;  %v2396_v49 = vpop.f32.mrb[46].mxu1 }
 0x607   : > { %v2149_v50 = vpack.c.bf16 %v1779_v46, %v1779_v46  ;;  %v1782_v36 = vadd.f32 %v2396_v49, %v2106_v34  ;;  %v1773_v22 = vpop.f32.mrb[47].mxu1 }
 0x608   : > { %v2147_v20 = vpack.c.bf16 %v1771_v48, %v1771_v48  ;;  %v1774_v25 = vadd.f32 %v2106_v34, %v1773_v22 }
 0x609   : > { %1864 = vst.msk [vmem:[%s3227_s22 + $0x38] sm:$0xf] %vm1849_vm2, %v2149_v50  ;;  %v2150_v51 = vpack.c.bf16 %v1782_v36, %v1782_v36 }
 0x60a   : > { %1862 = vst.msk [vmem:[%s3227_s22 + $0x30] sm:$0xf] %vm1849_vm2, %v2147_v20  ;;  %v2148_v35 = vpack.c.bf16 %v1774_v25, %v1774_v25 }
 0x60b   : > { %1865 = vst.msk [vmem:[%s3227_s22 + $0x3c] sm:$0xf] %vm1849_vm2, %v2150_v51 }
 0x60c   : > { %1863 = vst.msk [vmem:[%s3227_s22 + $0x34] sm:$0xf] %vm1849_vm2, %v2148_v35 }
 0x60d PF: > { %s3304_s25 = sld [smem:[#allocation10_spill]]  ;;  %s3305_s17 = sld [smem:[#allocation8_spill]] }
 0x60e   : > { %s3306_s18 = sld [smem:[#allocation9_spill]]  ;;  %s3307_s19 = sld [smem:[#allocation11_spill]] }
 0x60f   : > { %s3308_s20 = sld [smem:[#allocation12_spill]] }
 0x613   : > { %s23_s21 = sadd.s32 1, %s3304_s25  }
 0x614   : > { %p20_p8 = scmp.ge.s32.totalorder %s23_s21, 6  }
 0x616   :  { %22 = sbr.rel (!%p20_p8) target bundleno = 4 (0x4), region = 115 }
 0x61d   :  { %1896 = vsyncpa [#allocation3], 1 }
 0x61e   :  { %1898 = vsyncpa [#allocation3 + $0x1], 1 }
 0x61f   :  { %1899 = vsyncpa [#allocation5], 1 }

</bundles_post_ra>
